<compile_context>
chip_gen: v7x
topology: tpu7x:2x2x1
jax: 0.10.0
libtpu: 0.0.40
codegen_flags: <defaults>
</compile_context>

<pallas_src>
import jax
import jax.numpy as jnp
import numpy as np
from jax.experimental import pallas as pl
from jax.experimental.pallas import tpu as pltpu

H = 64          # real hidden size
HP = 128        # each gate block padded to one full 128-lane tile
GP = 4 * HP     # padded gate width


def _sigmoid(x):
    # sigmoid(x) = 0.5 * tanh(0.5 * x) + 0.5 : exactly equivalent, one EUP push.
    return 0.5 * jnp.tanh(0.5 * x) + 0.5


def lstm_fc_kernel(x_ref, wih_ref, whh_ref, b_ref, fcw_ref, fcb_ref, out_ref):
    # x_ref:   (T, B, I)  f32   (time-major: each step is a contiguous sublane slab)
    # wih_ref: (I, GP)    bf16
    # whh_ref: (HP, GP)   bf16  (padded rows/cols are zero)
    # b_ref:   (1, GP)    f32   (b_ih + b_hh, zero in padded lanes)
    # fcw_ref: (1, HP)    f32   fcb_ref: (1, 1) f32   out_ref: (B, 1) f32
    T, B, I = x_ref.shape
    Gp = b_ref.shape[1]
    Hp = Gp // 4

    # Hoisted input projection: ONE (T*B, I) x (I, GP) bf16 MXU pass for all timesteps.
    x_all = x_ref[...].reshape(T * B, I).astype(jnp.bfloat16)
    gx = jnp.dot(x_all, wih_ref[...], preferred_element_type=jnp.float32) + b_ref[...]

    def split_gates(g):  # gate order i, f, g, o (PyTorch), each padded to 128 lanes
        return (g[:, 0 * Hp:1 * Hp], g[:, 1 * Hp:2 * Hp],
                g[:, 2 * Hp:3 * Hp], g[:, 3 * Hp:4 * Hp])

    # ---- peeled t = 0: h = c = 0, so h@W_hh, the f-gate and f*c are all dead ----
    # Padded lanes: preact 0 -> sigmoid = 0.5, tanh = 0 -> c_pad = h_pad = 0 exactly.
    gi, _, gg, go = split_gates(gx[0:B, :])
    c = _sigmoid(gi) * jnp.tanh(gg)
    h = _sigmoid(go) * jnp.tanh(c)

    # ---- remaining steps, fully unrolled; only h @ W_hh sits on the serial chain ----
    # whh_ref[...] is read per step so the bf16 RHS streams VMEM -> MXU (no vreg spill).
    for t in range(1, T):
        gates = gx[t * B:(t + 1) * B, :] + jnp.dot(
            h.astype(jnp.bfloat16), whh_ref[...], preferred_element_type=jnp.float32)
        gi, gf, gg, go = split_gates(gates)
        c = _sigmoid(gf) * c + _sigmoid(gi) * jnp.tanh(gg)
        h = _sigmoid(go) * jnp.tanh(c)

    # Final FC (64 -> 1): VPU multiply + lane reduction; padded entries of h/fcw are zero.
    out_ref[...] = (jnp.sum(h * fcw_ref[...], axis=1, keepdims=True)
                    + fcb_ref[...]).astype(out_ref.dtype)


def prepare_params(w_ih, w_hh, b_ih, b_hh, fc_w, fc_b):
    """One-time prep: transpose, combine biases, pad each 64-wide gate block to 128
    lanes, and store the MXU weights in bf16 (single-pass matmul operands)."""
    H4 = w_ih.shape[0]
    Hr = H4 // 4

    wih_t = jnp.asarray(w_ih, jnp.float32).T                     # (I, 4H)
    whh_t = jnp.asarray(w_hh, jnp.float32).T                     # (H, 4H)
    b = (jnp.asarray(b_ih, jnp.float32)
         + jnp.asarray(b_hh, jnp.float32)).reshape(1, 4 * Hr)    # (1, 4H)

    def pad_gate_cols(m):  # (..., 4H) -> (..., GP): each gate block 64 -> 128 lanes
        parts = jnp.split(m, 4, axis=-1)
        pad = [(0, 0)] * (m.ndim - 1) + [(0, HP - Hr)]
        return jnp.concatenate([jnp.pad(p, pad) for p in parts], axis=-1)

    wih_p = pad_gate_cols(wih_t).astype(jnp.bfloat16)                               # (I, GP)
    whh_p = jnp.pad(pad_gate_cols(whh_t),
                    ((0, HP - Hr), (0, 0))).astype(jnp.bfloat16)                    # (HP, GP)
    b_p = pad_gate_cols(b)                                                          # (1, GP)
    fcw_p = jnp.pad(jnp.asarray(fc_w, jnp.float32), ((0, 0), (0, HP - Hr)))         # (1, HP)
    fcb = jnp.asarray(fc_b, jnp.float32).reshape(1, 1)                              # (1, 1)
    return wih_p, whh_p, b_p, fcw_p, fcb


@jax.jit
def lstm_model_forward(x, wih_p, whh_p, b_p, fcw_p, fcb):
    """x: (B, T, I) float32 (batch_first, like the PyTorch module). Returns (B, 1)."""
    B, T, I = x.shape
    x_tb = jnp.transpose(x.astype(jnp.float32), (1, 0, 2))   # time-major (T, B, I)
    vmem = pl.BlockSpec(memory_space=pltpu.MemorySpace.VMEM)
    return pl.pallas_call(
        lstm_fc_kernel,
        out_shape=jax.ShapeDtypeStruct((B, 1), jnp.float32),
        in_specs=[vmem] * 6,
        out_specs=vmem,
    )(x_tb, wih_p, whh_p, b_p, fcw_p, fcb)


def _reference_forward(x, w_ih, w_hh, b_ih, b_hh, fc_w, fc_b):
    """Pure-JAX f32 reference of the PyTorch LSTM forward (gate order i, f, g, o)."""
    B, T, I = x.shape
    Hr = w_hh.shape[1]
    h = jnp.zeros((B, Hr), jnp.float32)
    c = jnp.zeros((B, Hr), jnp.float32)
    for t in range(T):
        gates = x[:, t, :] @ w_ih.T + b_ih + h @ w_hh.T + b_hh
        i_g = jax.nn.sigmoid(gates[:, 0:Hr])
        f_g = jax.nn.sigmoid(gates[:, Hr:2 * Hr])
        g_g = jnp.tanh(gates[:, 2 * Hr:3 * Hr])
        o_g = jax.nn.sigmoid(gates[:, 3 * Hr:4 * Hr])
        c = f_g * c + i_g * g_g
        h = o_g * jnp.tanh(c)
    return h @ fc_w.T + fc_b


if __name__ == "__main__":
    B, T, I, Hh = 2, 8, 13, 64

    key = jax.random.PRNGKey(0)
    k = jax.random.split(key, 8)
    bound = 1.0 / np.sqrt(Hh)   # PyTorch default init range for LSTM / Linear

    x = jax.random.normal(k[0], (B, T, I), jnp.float32)
    w_ih = jax.random.uniform(k[1], (4 * Hh, I), jnp.float32, -bound, bound)
    w_hh = jax.random.uniform(k[2], (4 * Hh, Hh), jnp.float32, -bound, bound)
    b_ih = jax.random.uniform(k[3], (4 * Hh,), jnp.float32, -bound, bound)
    b_hh = jax.random.uniform(k[4], (4 * Hh,), jnp.float32, -bound, bound)
    fc_w = jax.random.uniform(k[5], (1, Hh), jnp.float32, -bound, bound)
    fc_b = jax.random.uniform(k[6], (1,), jnp.float32, -bound, bound)

    params = prepare_params(w_ih, w_hh, b_ih, b_hh, fc_w, fc_b)

    out = jax.block_until_ready(lstm_model_forward(x, *params))

    ref = _reference_forward(x, w_ih, w_hh, b_ih, b_hh, fc_w, fc_b)
    assert out.shape == (B, 1), out.shape
    # bf16 MXU operands -> relaxed tolerance vs. the f32 reference.
    np.testing.assert_allclose(np.asarray(out), np.asarray(ref), rtol=5e-2, atol=5e-3)

    print("KERNEL_OK")
</pallas_src>

<mosaic_0001>
module attributes {stable_mosaic.version = 11 : i64} {
  func.func @lstm_fc_kernel(%arg0: memref<8x2x13xf32, #tpu.memory_space<vmem>>, %arg1: memref<13x512xbf16, #tpu.memory_space<vmem>>, %arg2: memref<128x512xbf16, #tpu.memory_space<vmem>>, %arg3: memref<1x512xf32, #tpu.memory_space<vmem>>, %arg4: memref<1x128xf32, #tpu.memory_space<vmem>>, %arg5: memref<1x1xf32, #tpu.memory_space<vmem>>, %arg6: memref<2x1xf32, #tpu.memory_space<vmem>>) attributes {dimension_semantics = [], scalar_prefetch = 0 : i64, scratch_operands = 0 : i64, tpu.core_type = #tpu.core_type<tc>} {
    %c0 = arith.constant 0 : index
    %c0_0 = arith.constant 0 : index
    %c0_1 = arith.constant 0 : index
    %0 = vector.load %arg0[%c0, %c0_0, %c0_1] : memref<8x2x13xf32, #tpu.memory_space<vmem>>, vector<8x2x13xf32>
    %1 = vector.shape_cast %0 : vector<8x2x13xf32> to vector<16x13xf32>
    %2 = arith.truncf %1 : vector<16x13xf32> to vector<16x13xbf16>
    %c0_2 = arith.constant 0 : index
    %c0_3 = arith.constant 0 : index
    %3 = vector.load %arg1[%c0_2, %c0_3] : memref<13x512xbf16, #tpu.memory_space<vmem>>, vector<13x512xbf16>
    %cst = arith.constant dense<0.000000e+00> : vector<16x512xf32>
    %4 = tpu.matmul %2, %3, %cst {dimension_numbers = #tpu.dot_dimension_numbers<[1], [0], [0], [1], [0, 0, 1, 1], [], []>} : vector<16x13xbf16>, vector<13x512xbf16>, vector<16x512xf32> -> vector<16x512xf32>
    %c0_4 = arith.constant 0 : index
    %c0_5 = arith.constant 0 : index
    %5 = vector.load %arg3[%c0_4, %c0_5] : memref<1x512xf32, #tpu.memory_space<vmem>>, vector<1x512xf32>
    %6 = vector.broadcast %5 : vector<1x512xf32> to vector<16x512xf32>
    %7 = arith.addf %4, %6 : vector<16x512xf32>
    %8 = vector.extract_strided_slice %7 {offsets = [0, 0], sizes = [2, 512], strides = [1, 1]} : vector<16x512xf32> to vector<2x512xf32>
    %9 = vector.extract_strided_slice %8 {offsets = [0, 0], sizes = [2, 128], strides = [1, 1]} : vector<2x512xf32> to vector<2x128xf32>
    %10 = vector.extract_strided_slice %8 {offsets = [0, 256], sizes = [2, 128], strides = [1, 1]} : vector<2x512xf32> to vector<2x128xf32>
    %11 = vector.extract_strided_slice %8 {offsets = [0, 384], sizes = [2, 128], strides = [1, 1]} : vector<2x512xf32> to vector<2x128xf32>
    %cst_6 = arith.constant 5.000000e-01 : f32
    %12 = vector.broadcast %cst_6 : f32 to vector<2x128xf32>
    %13 = arith.mulf %12, %9 : vector<2x128xf32>
    %14 = math.tanh %13 : vector<2x128xf32>
    %cst_7 = arith.constant 5.000000e-01 : f32
    %15 = vector.broadcast %cst_7 : f32 to vector<2x128xf32>
    %16 = arith.mulf %15, %14 : vector<2x128xf32>
    %cst_8 = arith.constant 5.000000e-01 : f32
    %17 = vector.broadcast %cst_8 : f32 to vector<2x128xf32>
    %18 = arith.addf %16, %17 : vector<2x128xf32>
    %19 = math.tanh %10 : vector<2x128xf32>
    %20 = arith.mulf %18, %19 : vector<2x128xf32>
    %cst_9 = arith.constant 5.000000e-01 : f32
    %21 = vector.broadcast %cst_9 : f32 to vector<2x128xf32>
    %22 = arith.mulf %21, %11 : vector<2x128xf32>
    %23 = math.tanh %22 : vector<2x128xf32>
    %cst_10 = arith.constant 5.000000e-01 : f32
    %24 = vector.broadcast %cst_10 : f32 to vector<2x128xf32>
    %25 = arith.mulf %24, %23 : vector<2x128xf32>
    %cst_11 = arith.constant 5.000000e-01 : f32
    %26 = vector.broadcast %cst_11 : f32 to vector<2x128xf32>
    %27 = arith.addf %25, %26 : vector<2x128xf32>
    %28 = math.tanh %20 : vector<2x128xf32>
    %29 = arith.mulf %27, %28 : vector<2x128xf32>
    %30 = vector.extract_strided_slice %7 {offsets = [2, 0], sizes = [2, 512], strides = [1, 1]} : vector<16x512xf32> to vector<2x512xf32>
    %31 = arith.truncf %29 : vector<2x128xf32> to vector<2x128xbf16>
    %c0_12 = arith.constant 0 : index
    %c0_13 = arith.constant 0 : index
    %32 = vector.load %arg2[%c0_12, %c0_13] : memref<128x512xbf16, #tpu.memory_space<vmem>>, vector<128x512xbf16>
    %cst_14 = arith.constant dense<0.000000e+00> : vector<2x512xf32>
    %33 = tpu.matmul %31, %32, %cst_14 {dimension_numbers = #tpu.dot_dimension_numbers<[1], [0], [0], [1], [0, 0, 1, 1], [], []>} : vector<2x128xbf16>, vector<128x512xbf16>, vector<2x512xf32> -> vector<2x512xf32>
    %34 = arith.addf %30, %33 : vector<2x512xf32>
    %35 = vector.extract_strided_slice %34 {offsets = [0, 0], sizes = [2, 128], strides = [1, 1]} : vector<2x512xf32> to vector<2x128xf32>
    %36 = vector.extract_strided_slice %34 {offsets = [0, 128], sizes = [2, 128], strides = [1, 1]} : vector<2x512xf32> to vector<2x128xf32>
    %37 = vector.extract_strided_slice %34 {offsets = [0, 256], sizes = [2, 128], strides = [1, 1]} : vector<2x512xf32> to vector<2x128xf32>
    %38 = vector.extract_strided_slice %34 {offsets = [0, 384], sizes = [2, 128], strides = [1, 1]} : vector<2x512xf32> to vector<2x128xf32>
    %cst_15 = arith.constant 5.000000e-01 : f32
    %39 = vector.broadcast %cst_15 : f32 to vector<2x128xf32>
    %40 = arith.mulf %39, %36 : vector<2x128xf32>
    %41 = math.tanh %40 : vector<2x128xf32>
    %cst_16 = arith.constant 5.000000e-01 : f32
    %42 = vector.broadcast %cst_16 : f32 to vector<2x128xf32>
    %43 = arith.mulf %42, %41 : vector<2x128xf32>
    %cst_17 = arith.constant 5.000000e-01 : f32
    %44 = vector.broadcast %cst_17 : f32 to vector<2x128xf32>
    %45 = arith.addf %43, %44 : vector<2x128xf32>
    %46 = arith.mulf %45, %20 : vector<2x128xf32>
    %cst_18 = arith.constant 5.000000e-01 : f32
    %47 = vector.broadcast %cst_18 : f32 to vector<2x128xf32>
    %48 = arith.mulf %47, %35 : vector<2x128xf32>
    %49 = math.tanh %48 : vector<2x128xf32>
    %cst_19 = arith.constant 5.000000e-01 : f32
    %50 = vector.broadcast %cst_19 : f32 to vector<2x128xf32>
    %51 = arith.mulf %50, %49 : vector<2x128xf32>
    %cst_20 = arith.constant 5.000000e-01 : f32
    %52 = vector.broadcast %cst_20 : f32 to vector<2x128xf32>
    %53 = arith.addf %51, %52 : vector<2x128xf32>
    %54 = math.tanh %37 : vector<2x128xf32>
    %55 = arith.mulf %53, %54 : vector<2x128xf32>
    %56 = arith.addf %46, %55 : vector<2x128xf32>
    %cst_21 = arith.constant 5.000000e-01 : f32
    %57 = vector.broadcast %cst_21 : f32 to vector<2x128xf32>
    %58 = arith.mulf %57, %38 : vector<2x128xf32>
    %59 = math.tanh %58 : vector<2x128xf32>
    %cst_22 = arith.constant 5.000000e-01 : f32
    %60 = vector.broadcast %cst_22 : f32 to vector<2x128xf32>
    %61 = arith.mulf %60, %59 : vector<2x128xf32>
    %cst_23 = arith.constant 5.000000e-01 : f32
    %62 = vector.broadcast %cst_23 : f32 to vector<2x128xf32>
    %63 = arith.addf %61, %62 : vector<2x128xf32>
    %64 = math.tanh %56 : vector<2x128xf32>
    %65 = arith.mulf %63, %64 : vector<2x128xf32>
    %66 = vector.extract_strided_slice %7 {offsets = [4, 0], sizes = [2, 512], strides = [1, 1]} : vector<16x512xf32> to vector<2x512xf32>
    %67 = arith.truncf %65 : vector<2x128xf32> to vector<2x128xbf16>
    %c0_24 = arith.constant 0 : index
    %c0_25 = arith.constant 0 : index
    %68 = vector.load %arg2[%c0_24, %c0_25] : memref<128x512xbf16, #tpu.memory_space<vmem>>, vector<128x512xbf16>
    %cst_26 = arith.constant dense<0.000000e+00> : vector<2x512xf32>
    %69 = tpu.matmul %67, %68, %cst_26 {dimension_numbers = #tpu.dot_dimension_numbers<[1], [0], [0], [1], [0, 0, 1, 1], [], []>} : vector<2x128xbf16>, vector<128x512xbf16>, vector<2x512xf32> -> vector<2x512xf32>
    %70 = arith.addf %66, %69 : vector<2x512xf32>
    %71 = vector.extract_strided_slice %70 {offsets = [0, 0], sizes = [2, 128], strides = [1, 1]} : vector<2x512xf32> to vector<2x128xf32>
    %72 = vector.extract_strided_slice %70 {offsets = [0, 128], sizes = [2, 128], strides = [1, 1]} : vector<2x512xf32> to vector<2x128xf32>
    %73 = vector.extract_strided_slice %70 {offsets = [0, 256], sizes = [2, 128], strides = [1, 1]} : vector<2x512xf32> to vector<2x128xf32>
    %74 = vector.extract_strided_slice %70 {offsets = [0, 384], sizes = [2, 128], strides = [1, 1]} : vector<2x512xf32> to vector<2x128xf32>
    %cst_27 = arith.constant 5.000000e-01 : f32
    %75 = vector.broadcast %cst_27 : f32 to vector<2x128xf32>
    %76 = arith.mulf %75, %72 : vector<2x128xf32>
    %77 = math.tanh %76 : vector<2x128xf32>
    %cst_28 = arith.constant 5.000000e-01 : f32
    %78 = vector.broadcast %cst_28 : f32 to vector<2x128xf32>
    %79 = arith.mulf %78, %77 : vector<2x128xf32>
    %cst_29 = arith.constant 5.000000e-01 : f32
    %80 = vector.broadcast %cst_29 : f32 to vector<2x128xf32>
    %81 = arith.addf %79, %80 : vector<2x128xf32>
    %82 = arith.mulf %81, %56 : vector<2x128xf32>
    %cst_30 = arith.constant 5.000000e-01 : f32
    %83 = vector.broadcast %cst_30 : f32 to vector<2x128xf32>
    %84 = arith.mulf %83, %71 : vector<2x128xf32>
    %85 = math.tanh %84 : vector<2x128xf32>
    %cst_31 = arith.constant 5.000000e-01 : f32
    %86 = vector.broadcast %cst_31 : f32 to vector<2x128xf32>
    %87 = arith.mulf %86, %85 : vector<2x128xf32>
    %cst_32 = arith.constant 5.000000e-01 : f32
    %88 = vector.broadcast %cst_32 : f32 to vector<2x128xf32>
    %89 = arith.addf %87, %88 : vector<2x128xf32>
    %90 = math.tanh %73 : vector<2x128xf32>
    %91 = arith.mulf %89, %90 : vector<2x128xf32>
    %92 = arith.addf %82, %91 : vector<2x128xf32>
    %cst_33 = arith.constant 5.000000e-01 : f32
    %93 = vector.broadcast %cst_33 : f32 to vector<2x128xf32>
    %94 = arith.mulf %93, %74 : vector<2x128xf32>
    %95 = math.tanh %94 : vector<2x128xf32>
    %cst_34 = arith.constant 5.000000e-01 : f32
    %96 = vector.broadcast %cst_34 : f32 to vector<2x128xf32>
    %97 = arith.mulf %96, %95 : vector<2x128xf32>
    %cst_35 = arith.constant 5.000000e-01 : f32
    %98 = vector.broadcast %cst_35 : f32 to vector<2x128xf32>
    %99 = arith.addf %97, %98 : vector<2x128xf32>
    %100 = math.tanh %92 : vector<2x128xf32>
    %101 = arith.mulf %99, %100 : vector<2x128xf32>
    %102 = vector.extract_strided_slice %7 {offsets = [6, 0], sizes = [2, 512], strides = [1, 1]} : vector<16x512xf32> to vector<2x512xf32>
    %103 = arith.truncf %101 : vector<2x128xf32> to vector<2x128xbf16>
    %c0_36 = arith.constant 0 : index
    %c0_37 = arith.constant 0 : index
    %104 = vector.load %arg2[%c0_36, %c0_37] : memref<128x512xbf16, #tpu.memory_space<vmem>>, vector<128x512xbf16>
    %cst_38 = arith.constant dense<0.000000e+00> : vector<2x512xf32>
    %105 = tpu.matmul %103, %104, %cst_38 {dimension_numbers = #tpu.dot_dimension_numbers<[1], [0], [0], [1], [0, 0, 1, 1], [], []>} : vector<2x128xbf16>, vector<128x512xbf16>, vector<2x512xf32> -> vector<2x512xf32>
    %106 = arith.addf %102, %105 : vector<2x512xf32>
    %107 = vector.extract_strided_slice %106 {offsets = [0, 0], sizes = [2, 128], strides = [1, 1]} : vector<2x512xf32> to vector<2x128xf32>
    %108 = vector.extract_strided_slice %106 {offsets = [0, 128], sizes = [2, 128], strides = [1, 1]} : vector<2x512xf32> to vector<2x128xf32>
    %109 = vector.extract_strided_slice %106 {offsets = [0, 256], sizes = [2, 128], strides = [1, 1]} : vector<2x512xf32> to vector<2x128xf32>
    %110 = vector.extract_strided_slice %106 {offsets = [0, 384], sizes = [2, 128], strides = [1, 1]} : vector<2x512xf32> to vector<2x128xf32>
    %cst_39 = arith.constant 5.000000e-01 : f32
    %111 = vector.broadcast %cst_39 : f32 to vector<2x128xf32>
    %112 = arith.mulf %111, %108 : vector<2x128xf32>
    %113 = math.tanh %112 : vector<2x128xf32>
    %cst_40 = arith.constant 5.000000e-01 : f32
    %114 = vector.broadcast %cst_40 : f32 to vector<2x128xf32>
    %115 = arith.mulf %114, %113 : vector<2x128xf32>
    %cst_41 = arith.constant 5.000000e-01 : f32
    %116 = vector.broadcast %cst_41 : f32 to vector<2x128xf32>
    %117 = arith.addf %115, %116 : vector<2x128xf32>
    %118 = arith.mulf %117, %92 : vector<2x128xf32>
    %cst_42 = arith.constant 5.000000e-01 : f32
    %119 = vector.broadcast %cst_42 : f32 to vector<2x128xf32>
    %120 = arith.mulf %119, %107 : vector<2x128xf32>
    %121 = math.tanh %120 : vector<2x128xf32>
    %cst_43 = arith.constant 5.000000e-01 : f32
    %122 = vector.broadcast %cst_43 : f32 to vector<2x128xf32>
    %123 = arith.mulf %122, %121 : vector<2x128xf32>
    %cst_44 = arith.constant 5.000000e-01 : f32
    %124 = vector.broadcast %cst_44 : f32 to vector<2x128xf32>
    %125 = arith.addf %123, %124 : vector<2x128xf32>
    %126 = math.tanh %109 : vector<2x128xf32>
    %127 = arith.mulf %125, %126 : vector<2x128xf32>
    %128 = arith.addf %118, %127 : vector<2x128xf32>
    %cst_45 = arith.constant 5.000000e-01 : f32
    %129 = vector.broadcast %cst_45 : f32 to vector<2x128xf32>
    %130 = arith.mulf %129, %110 : vector<2x128xf32>
    %131 = math.tanh %130 : vector<2x128xf32>
    %cst_46 = arith.constant 5.000000e-01 : f32
    %132 = vector.broadcast %cst_46 : f32 to vector<2x128xf32>
    %133 = arith.mulf %132, %131 : vector<2x128xf32>
    %cst_47 = arith.constant 5.000000e-01 : f32
    %134 = vector.broadcast %cst_47 : f32 to vector<2x128xf32>
    %135 = arith.addf %133, %134 : vector<2x128xf32>
    %136 = math.tanh %128 : vector<2x128xf32>
    %137 = arith.mulf %135, %136 : vector<2x128xf32>
    %138 = vector.extract_strided_slice %7 {offsets = [8, 0], sizes = [2, 512], strides = [1, 1]} : vector<16x512xf32> to vector<2x512xf32>
    %139 = arith.truncf %137 : vector<2x128xf32> to vector<2x128xbf16>
    %c0_48 = arith.constant 0 : index
    %c0_49 = arith.constant 0 : index
    %140 = vector.load %arg2[%c0_48, %c0_49] : memref<128x512xbf16, #tpu.memory_space<vmem>>, vector<128x512xbf16>
    %cst_50 = arith.constant dense<0.000000e+00> : vector<2x512xf32>
    %141 = tpu.matmul %139, %140, %cst_50 {dimension_numbers = #tpu.dot_dimension_numbers<[1], [0], [0], [1], [0, 0, 1, 1], [], []>} : vector<2x128xbf16>, vector<128x512xbf16>, vector<2x512xf32> -> vector<2x512xf32>
    %142 = arith.addf %138, %141 : vector<2x512xf32>
    %143 = vector.extract_strided_slice %142 {offsets = [0, 0], sizes = [2, 128], strides = [1, 1]} : vector<2x512xf32> to vector<2x128xf32>
    %144 = vector.extract_strided_slice %142 {offsets = [0, 128], sizes = [2, 128], strides = [1, 1]} : vector<2x512xf32> to vector<2x128xf32>
    %145 = vector.extract_strided_slice %142 {offsets = [0, 256], sizes = [2, 128], strides = [1, 1]} : vector<2x512xf32> to vector<2x128xf32>
    %146 = vector.extract_strided_slice %142 {offsets = [0, 384], sizes = [2, 128], strides = [1, 1]} : vector<2x512xf32> to vector<2x128xf32>
    %cst_51 = arith.constant 5.000000e-01 : f32
    %147 = vector.broadcast %cst_51 : f32 to vector<2x128xf32>
    %148 = arith.mulf %147, %144 : vector<2x128xf32>
    %149 = math.tanh %148 : vector<2x128xf32>
    %cst_52 = arith.constant 5.000000e-01 : f32
    %150 = vector.broadcast %cst_52 : f32 to vector<2x128xf32>
    %151 = arith.mulf %150, %149 : vector<2x128xf32>
    %cst_53 = arith.constant 5.000000e-01 : f32
    %152 = vector.broadcast %cst_53 : f32 to vector<2x128xf32>
    %153 = arith.addf %151, %152 : vector<2x128xf32>
    %154 = arith.mulf %153, %128 : vector<2x128xf32>
    %cst_54 = arith.constant 5.000000e-01 : f32
    %155 = vector.broadcast %cst_54 : f32 to vector<2x128xf32>
    %156 = arith.mulf %155, %143 : vector<2x128xf32>
    %157 = math.tanh %156 : vector<2x128xf32>
    %cst_55 = arith.constant 5.000000e-01 : f32
    %158 = vector.broadcast %cst_55 : f32 to vector<2x128xf32>
    %159 = arith.mulf %158, %157 : vector<2x128xf32>
    %cst_56 = arith.constant 5.000000e-01 : f32
    %160 = vector.broadcast %cst_56 : f32 to vector<2x128xf32>
    %161 = arith.addf %159, %160 : vector<2x128xf32>
    %162 = math.tanh %145 : vector<2x128xf32>
    %163 = arith.mulf %161, %162 : vector<2x128xf32>
    %164 = arith.addf %154, %163 : vector<2x128xf32>
    %cst_57 = arith.constant 5.000000e-01 : f32
    %165 = vector.broadcast %cst_57 : f32 to vector<2x128xf32>
    %166 = arith.mulf %165, %146 : vector<2x128xf32>
    %167 = math.tanh %166 : vector<2x128xf32>
    %cst_58 = arith.constant 5.000000e-01 : f32
    %168 = vector.broadcast %cst_58 : f32 to vector<2x128xf32>
    %169 = arith.mulf %168, %167 : vector<2x128xf32>
    %cst_59 = arith.constant 5.000000e-01 : f32
    %170 = vector.broadcast %cst_59 : f32 to vector<2x128xf32>
    %171 = arith.addf %169, %170 : vector<2x128xf32>
    %172 = math.tanh %164 : vector<2x128xf32>
    %173 = arith.mulf %171, %172 : vector<2x128xf32>
    %174 = vector.extract_strided_slice %7 {offsets = [10, 0], sizes = [2, 512], strides = [1, 1]} : vector<16x512xf32> to vector<2x512xf32>
    %175 = arith.truncf %173 : vector<2x128xf32> to vector<2x128xbf16>
    %c0_60 = arith.constant 0 : index
    %c0_61 = arith.constant 0 : index
    %176 = vector.load %arg2[%c0_60, %c0_61] : memref<128x512xbf16, #tpu.memory_space<vmem>>, vector<128x512xbf16>
    %cst_62 = arith.constant dense<0.000000e+00> : vector<2x512xf32>
    %177 = tpu.matmul %175, %176, %cst_62 {dimension_numbers = #tpu.dot_dimension_numbers<[1], [0], [0], [1], [0, 0, 1, 1], [], []>} : vector<2x128xbf16>, vector<128x512xbf16>, vector<2x512xf32> -> vector<2x512xf32>
    %178 = arith.addf %174, %177 : vector<2x512xf32>
    %179 = vector.extract_strided_slice %178 {offsets = [0, 0], sizes = [2, 128], strides = [1, 1]} : vector<2x512xf32> to vector<2x128xf32>
    %180 = vector.extract_strided_slice %178 {offsets = [0, 128], sizes = [2, 128], strides = [1, 1]} : vector<2x512xf32> to vector<2x128xf32>
    %181 = vector.extract_strided_slice %178 {offsets = [0, 256], sizes = [2, 128], strides = [1, 1]} : vector<2x512xf32> to vector<2x128xf32>
    %182 = vector.extract_strided_slice %178 {offsets = [0, 384], sizes = [2, 128], strides = [1, 1]} : vector<2x512xf32> to vector<2x128xf32>
    %cst_63 = arith.constant 5.000000e-01 : f32
    %183 = vector.broadcast %cst_63 : f32 to vector<2x128xf32>
    %184 = arith.mulf %183, %180 : vector<2x128xf32>
    %185 = math.tanh %184 : vector<2x128xf32>
    %cst_64 = arith.constant 5.000000e-01 : f32
    %186 = vector.broadcast %cst_64 : f32 to vector<2x128xf32>
    %187 = arith.mulf %186, %185 : vector<2x128xf32>
    %cst_65 = arith.constant 5.000000e-01 : f32
    %188 = vector.broadcast %cst_65 : f32 to vector<2x128xf32>
    %189 = arith.addf %187, %188 : vector<2x128xf32>
    %190 = arith.mulf %189, %164 : vector<2x128xf32>
    %cst_66 = arith.constant 5.000000e-01 : f32
    %191 = vector.broadcast %cst_66 : f32 to vector<2x128xf32>
    %192 = arith.mulf %191, %179 : vector<2x128xf32>
    %193 = math.tanh %192 : vector<2x128xf32>
    %cst_67 = arith.constant 5.000000e-01 : f32
    %194 = vector.broadcast %cst_67 : f32 to vector<2x128xf32>
    %195 = arith.mulf %194, %193 : vector<2x128xf32>
    %cst_68 = arith.constant 5.000000e-01 : f32
    %196 = vector.broadcast %cst_68 : f32 to vector<2x128xf32>
    %197 = arith.addf %195, %196 : vector<2x128xf32>
    %198 = math.tanh %181 : vector<2x128xf32>
    %199 = arith.mulf %197, %198 : vector<2x128xf32>
    %200 = arith.addf %190, %199 : vector<2x128xf32>
    %cst_69 = arith.constant 5.000000e-01 : f32
    %201 = vector.broadcast %cst_69 : f32 to vector<2x128xf32>
    %202 = arith.mulf %201, %182 : vector<2x128xf32>
    %203 = math.tanh %202 : vector<2x128xf32>
    %cst_70 = arith.constant 5.000000e-01 : f32
    %204 = vector.broadcast %cst_70 : f32 to vector<2x128xf32>
    %205 = arith.mulf %204, %203 : vector<2x128xf32>
    %cst_71 = arith.constant 5.000000e-01 : f32
    %206 = vector.broadcast %cst_71 : f32 to vector<2x128xf32>
    %207 = arith.addf %205, %206 : vector<2x128xf32>
    %208 = math.tanh %200 : vector<2x128xf32>
    %209 = arith.mulf %207, %208 : vector<2x128xf32>
    %210 = vector.extract_strided_slice %7 {offsets = [12, 0], sizes = [2, 512], strides = [1, 1]} : vector<16x512xf32> to vector<2x512xf32>
    %211 = arith.truncf %209 : vector<2x128xf32> to vector<2x128xbf16>
    %c0_72 = arith.constant 0 : index
    %c0_73 = arith.constant 0 : index
    %212 = vector.load %arg2[%c0_72, %c0_73] : memref<128x512xbf16, #tpu.memory_space<vmem>>, vector<128x512xbf16>
    %cst_74 = arith.constant dense<0.000000e+00> : vector<2x512xf32>
    %213 = tpu.matmul %211, %212, %cst_74 {dimension_numbers = #tpu.dot_dimension_numbers<[1], [0], [0], [1], [0, 0, 1, 1], [], []>} : vector<2x128xbf16>, vector<128x512xbf16>, vector<2x512xf32> -> vector<2x512xf32>
    %214 = arith.addf %210, %213 : vector<2x512xf32>
    %215 = vector.extract_strided_slice %214 {offsets = [0, 0], sizes = [2, 128], strides = [1, 1]} : vector<2x512xf32> to vector<2x128xf32>
    %216 = vector.extract_strided_slice %214 {offsets = [0, 128], sizes = [2, 128], strides = [1, 1]} : vector<2x512xf32> to vector<2x128xf32>
    %217 = vector.extract_strided_slice %214 {offsets = [0, 256], sizes = [2, 128], strides = [1, 1]} : vector<2x512xf32> to vector<2x128xf32>
    %218 = vector.extract_strided_slice %214 {offsets = [0, 384], sizes = [2, 128], strides = [1, 1]} : vector<2x512xf32> to vector<2x128xf32>
    %cst_75 = arith.constant 5.000000e-01 : f32
    %219 = vector.broadcast %cst_75 : f32 to vector<2x128xf32>
    %220 = arith.mulf %219, %216 : vector<2x128xf32>
    %221 = math.tanh %220 : vector<2x128xf32>
    %cst_76 = arith.constant 5.000000e-01 : f32
    %222 = vector.broadcast %cst_76 : f32 to vector<2x128xf32>
    %223 = arith.mulf %222, %221 : vector<2x128xf32>
    %cst_77 = arith.constant 5.000000e-01 : f32
    %224 = vector.broadcast %cst_77 : f32 to vector<2x128xf32>
    %225 = arith.addf %223, %224 : vector<2x128xf32>
    %226 = arith.mulf %225, %200 : vector<2x128xf32>
    %cst_78 = arith.constant 5.000000e-01 : f32
    %227 = vector.broadcast %cst_78 : f32 to vector<2x128xf32>
    %228 = arith.mulf %227, %215 : vector<2x128xf32>
    %229 = math.tanh %228 : vector<2x128xf32>
    %cst_79 = arith.constant 5.000000e-01 : f32
    %230 = vector.broadcast %cst_79 : f32 to vector<2x128xf32>
    %231 = arith.mulf %230, %229 : vector<2x128xf32>
    %cst_80 = arith.constant 5.000000e-01 : f32
    %232 = vector.broadcast %cst_80 : f32 to vector<2x128xf32>
    %233 = arith.addf %231, %232 : vector<2x128xf32>
    %234 = math.tanh %217 : vector<2x128xf32>
    %235 = arith.mulf %233, %234 : vector<2x128xf32>
    %236 = arith.addf %226, %235 : vector<2x128xf32>
    %cst_81 = arith.constant 5.000000e-01 : f32
    %237 = vector.broadcast %cst_81 : f32 to vector<2x128xf32>
    %238 = arith.mulf %237, %218 : vector<2x128xf32>
    %239 = math.tanh %238 : vector<2x128xf32>
    %cst_82 = arith.constant 5.000000e-01 : f32
    %240 = vector.broadcast %cst_82 : f32 to vector<2x128xf32>
    %241 = arith.mulf %240, %239 : vector<2x128xf32>
    %cst_83 = arith.constant 5.000000e-01 : f32
    %242 = vector.broadcast %cst_83 : f32 to vector<2x128xf32>
    %243 = arith.addf %241, %242 : vector<2x128xf32>
    %244 = math.tanh %236 : vector<2x128xf32>
    %245 = arith.mulf %243, %244 : vector<2x128xf32>
    %246 = vector.extract_strided_slice %7 {offsets = [14, 0], sizes = [2, 512], strides = [1, 1]} : vector<16x512xf32> to vector<2x512xf32>
    %247 = arith.truncf %245 : vector<2x128xf32> to vector<2x128xbf16>
    %c0_84 = arith.constant 0 : index
    %c0_85 = arith.constant 0 : index
    %248 = vector.load %arg2[%c0_84, %c0_85] : memref<128x512xbf16, #tpu.memory_space<vmem>>, vector<128x512xbf16>
    %cst_86 = arith.constant dense<0.000000e+00> : vector<2x512xf32>
    %249 = tpu.matmul %247, %248, %cst_86 {dimension_numbers = #tpu.dot_dimension_numbers<[1], [0], [0], [1], [0, 0, 1, 1], [], []>} : vector<2x128xbf16>, vector<128x512xbf16>, vector<2x512xf32> -> vector<2x512xf32>
    %250 = arith.addf %246, %249 : vector<2x512xf32>
    %251 = vector.extract_strided_slice %250 {offsets = [0, 0], sizes = [2, 128], strides = [1, 1]} : vector<2x512xf32> to vector<2x128xf32>
    %252 = vector.extract_strided_slice %250 {offsets = [0, 128], sizes = [2, 128], strides = [1, 1]} : vector<2x512xf32> to vector<2x128xf32>
    %253 = vector.extract_strided_slice %250 {offsets = [0, 256], sizes = [2, 128], strides = [1, 1]} : vector<2x512xf32> to vector<2x128xf32>
    %254 = vector.extract_strided_slice %250 {offsets = [0, 384], sizes = [2, 128], strides = [1, 1]} : vector<2x512xf32> to vector<2x128xf32>
    %cst_87 = arith.constant 5.000000e-01 : f32
    %255 = vector.broadcast %cst_87 : f32 to vector<2x128xf32>
    %256 = arith.mulf %255, %252 : vector<2x128xf32>
    %257 = math.tanh %256 : vector<2x128xf32>
    %cst_88 = arith.constant 5.000000e-01 : f32
    %258 = vector.broadcast %cst_88 : f32 to vector<2x128xf32>
    %259 = arith.mulf %258, %257 : vector<2x128xf32>
    %cst_89 = arith.constant 5.000000e-01 : f32
    %260 = vector.broadcast %cst_89 : f32 to vector<2x128xf32>
    %261 = arith.addf %259, %260 : vector<2x128xf32>
    %262 = arith.mulf %261, %236 : vector<2x128xf32>
    %cst_90 = arith.constant 5.000000e-01 : f32
    %263 = vector.broadcast %cst_90 : f32 to vector<2x128xf32>
    %264 = arith.mulf %263, %251 : vector<2x128xf32>
    %265 = math.tanh %264 : vector<2x128xf32>
    %cst_91 = arith.constant 5.000000e-01 : f32
    %266 = vector.broadcast %cst_91 : f32 to vector<2x128xf32>
    %267 = arith.mulf %266, %265 : vector<2x128xf32>
    %cst_92 = arith.constant 5.000000e-01 : f32
    %268 = vector.broadcast %cst_92 : f32 to vector<2x128xf32>
    %269 = arith.addf %267, %268 : vector<2x128xf32>
    %270 = math.tanh %253 : vector<2x128xf32>
    %271 = arith.mulf %269, %270 : vector<2x128xf32>
    %272 = arith.addf %262, %271 : vector<2x128xf32>
    %cst_93 = arith.constant 5.000000e-01 : f32
    %273 = vector.broadcast %cst_93 : f32 to vector<2x128xf32>
    %274 = arith.mulf %273, %254 : vector<2x128xf32>
    %275 = math.tanh %274 : vector<2x128xf32>
    %cst_94 = arith.constant 5.000000e-01 : f32
    %276 = vector.broadcast %cst_94 : f32 to vector<2x128xf32>
    %277 = arith.mulf %276, %275 : vector<2x128xf32>
    %cst_95 = arith.constant 5.000000e-01 : f32
    %278 = vector.broadcast %cst_95 : f32 to vector<2x128xf32>
    %279 = arith.addf %277, %278 : vector<2x128xf32>
    %280 = math.tanh %272 : vector<2x128xf32>
    %281 = arith.mulf %279, %280 : vector<2x128xf32>
    %c0_96 = arith.constant 0 : index
    %c0_97 = arith.constant 0 : index
    %282 = vector.load %arg4[%c0_96, %c0_97] : memref<1x128xf32, #tpu.memory_space<vmem>>, vector<1x128xf32>
    %283 = vector.broadcast %282 : vector<1x128xf32> to vector<2x128xf32>
    %284 = arith.mulf %281, %283 : vector<2x128xf32>
    %cst_98 = arith.constant dense<0.000000e+00> : vector<2xf32>
    %285 = vector.multi_reduction <add>, %284, %cst_98 [1] : vector<2x128xf32> to vector<2xf32>
    %286 = vector.shape_cast %285 : vector<2xf32> to vector<2x1xf32>
    %c0_99 = arith.constant 0 : index
    %c0_100 = arith.constant 0 : index
    %287 = vector.load %arg5[%c0_99, %c0_100] : memref<1x1xf32, #tpu.memory_space<vmem>>, vector<1x1xf32>
    %288 = vector.broadcast %287 : vector<1x1xf32> to vector<2x1xf32>
    %289 = arith.addf %286, %288 : vector<2x1xf32>
    %c0_101 = arith.constant 0 : index
    %c0_102 = arith.constant 0 : index
    %290 = vector.load %arg6[%c0_101, %c0_102] : memref<2x1xf32, #tpu.memory_space<vmem>>, vector<2x1xf32>
    tpu.vector_store %arg6[%c0_101, %c0_102], %289 {strides = array<i32>} : memref<2x1xf32, #tpu.memory_space<vmem>>, vector<2x1xf32>,
    return
  }
}

</mosaic_0001>

<bundles_post_ra>
// kernel: lstm_model_forward.1
= control target key start
LH: loop header
LB: loop body
LE: loop exit
PB: predicated region body
PF: predicated region fallthrough
CT: control target
= control target key end

     0   :  { %s2007_s0 = inlined_call_operand.vmem [shape: f32[8,2,13], index: 0, kind: input, shape index: {}]   ;;  %s2008_s1 = inlined_call_operand.vmem [shape: bf16[13,512], index: 1, kind: input, shape index: {}]   ;;  %s2009_s2 = inlined_call_operand.hbm [shape: bf16[128,512], index: 2, kind: input, shape index: {}]   ;;  %s2010_s3 = inlined_call_operand.vmem [shape: f32[1,512], index: 3, kind: input, shape index: {}]   ;;  %s2011_s4 = inlined_call_operand.vmem [shape: f32[1,128], index: 4, kind: input, shape index: {}]   ;;  %s2012_s5 = inlined_call_operand.<no memory space> [shape: f32[1,1], index: 5, kind: input, shape index: {}]   ;;  %s2013_s6 = inlined_call_operand.vmem [shape: f32[2,1], index: 6, kind: output, shape index: {}]  }
   0x1   :  { %v11_v0 = vstv %s2012_s5 }
   0x2   :  { %12 = vst [vmem:[#allocation2] sm:$0x1] %v11_v0 }
   0x3   :  { %13 = vsyncpa [#allocation4], 0  ;;  %s1517_s23 = smov [#allocation3]   ;;  %s1493_s27 = scalar_lea.hbm %s2009_s2, 4096 }
   0x4   :  { %s23_s24 = sshll.u32 %s1517_s23, 4  ;;  %p1494_p0 = scmp.ne.s32.totalorder %s2009_s2, %s1493_s27  ;;  %s24_s24 = int_to_ptr.vmem [resolvable:$true] %s23_s24 }
   0x5   :  { %p1497_p1 = scmp.lt.u32.totalorder %s1493_s27, %s2009_s2 }
   0x7   :  { %p1499_p2 = pnand %p1497_p1, %p1494_p0 }
   0x9   :  { %1502 = shalt.err (!%p1499_p2)
}
   0xa   :  { %s1503_s5 = scalar_lea.vmem %s24_s24, 4096  ;;  %p1508_p4 = scmp.lt.s32.totalorder %s24_s24, %s24_s24 }
   0xb   :  { %p1504_p3 = scmp.ne.s32.totalorder %s24_s24, %s1503_s5  ;;  %p1509_p5 = scmp.lt.s32.totalorder %s1503_s5, %s1503_s5 }
   0xd   :  { %p1510_p6 = por %p1509_p5, %p1508_p4 }
   0xf   :  { %p1511_p7 = pnand %p1510_p6, %p1504_p3 }
  0x11   :  { %1514 = shalt.err (!%p1511_p7)
}
  0x12   :  { %s1518_s8 = smov 256   ;;  %s1519_s9 = smov 16  }
  0x13   :  { %29 = dma.hbm_to_vmem [thread:$0]  %s2009_s2, 4096, %s24_s24, [#allocation4], %s1518_s8, %s1518_s8, %s1519_s9  }
  0x14   :  { %1515 = dma.done.wait [#allocation4], 4096  }
  0x15   :  { %1516 = vsyncadd [#allocation4], 4294963200  ;;  %vm139_vm0 = vcmask 1045504   ;;  %v1520_v1 = vmov 0   ;;  %v61_v2 = vlaneseq  ;;  %v1521_v3 = vmov 1983009808  }
  0x16   :  { %187 = vmatprep.mubr.bf16.mxu0 %v1520_v1  ;;  %230 = vmatprep.mubr.bf16.mxu1 %v1520_v1  ;;  %v59_v4 = vunpack.c.l.s4 %v1521_v3  ;;  %vm140_vm1 = vcmask 1046528   ;;  %v1522_v5 = vmov 65535   ;;  %v1361_v10 = vld [vmem:[%s2008_s1 + $0x4] ss:$16 sps:$4 sm:$0x7f]   ;;  %vm135_vm2 = vcmask 105472  }
  0x17   :  { %v141_v6 = vsel %vm139_vm0, 4294967295, %v1522_v5  ;;  %v1575_v8 = vshrl.u32 %v61_v2, 7  ;;  %v1363_v11 = vld [vmem:[%s2008_s1] ss:$16 sps:$4 sm:$0x7f]   ;;  %vm1296_vm3 = vcmask 1047558  }
  0x18   :  { %v60_v7 = vunpack.c.0.s8 %v59_v4  ;;  %v142_v9 = vsel %vm140_vm1, %v141_v6, 0  ;;  %v1364_v13 = vld [vmem:[%s2008_s1 + $0xc] ss:$16 sps:$4 sm:$0x7f]   ;;  %v40_v14 = vld [vmem:[%s2007_s0] sm:$0x3] }
  0x19   :  { %v147_v12 = vand.u32 %v1361_v10, %v142_v9  ;;  %v144_v16 = vand.u32 %v1363_v11, %v142_v9  ;;  %v41_v17 = vld [vmem:[%s2007_s0 + $0x2] sm:$0x3]  ;;  %v42_v18 = vld [vmem:[%s2007_s0 + $0x4] sm:$0x3]  ;;  %v43_v19 = vld [vmem:[%s2007_s0 + $0x6] sm:$0x3]  ;;  %v153_v20 = vand.u32 %v1364_v13, %v142_v9 }
  0x1a   :  { %v63_v15 = vsub.s32 %v60_v7, %v1575_v8  ;;  %v44_v21 = vld [vmem:[%s2007_s0 + $0x8] sm:$0x3]  ;;  %v45_v22 = vld [vmem:[%s2007_s0 + $0xa] sm:$0x3]  ;;  %v46_v23 = vld [vmem:[%s2007_s0 + $0xc] sm:$0x3]  ;;  %v56_v24 = vcombine.low %v40_v14, %v41_v17  ;;  %v57_v25 = vcombine.low %v42_v18, %v43_v19 }
  0x1b   :  { %155 = vmatprep.subr.bf16.mxu0 %v147_v12  ;;  %v47_v26 = vld [vmem:[%s2007_s0 + $0xe] sm:$0x3]  ;;  %v73_v27 = vcombine.low %v44_v21, %v45_v22  ;;  %v1366_v28 = vld [vmem:[%s2008_s1 + $0x8] ss:$16 sps:$4 sm:$0x7f]   ;;  %198 = vmatprep.subr.bf16.mxu1 %v153_v20  ;;  %v101_v7 = vsub.s32 0, %v1575_v8 }
  0x1c   :  { %156 = vmatpush1.bf16.msra.mxu0 %v144_v16  ;;  %v64_v29 = vrot.slane %v56_v24, %v63_v15  ;;  %v71_v30 = vrot.slane %v57_v25, %v63_v15  ;;  %v74_v31 = vcombine.low %v46_v23, %v47_v26  ;;  %v150_v33 = vand.u32 %v1366_v28, %v142_v9  ;;  %v1616_v38 = vld [vmem:[#allocation3 + $0x4] ss:$16 sps:$4 sm:$0xff]   ;;  %v1618_v39 = vld [vmem:[#allocation3 + $0xc] ss:$16 sps:$4 sm:$0xff]   ;;  %v1620_v40 = vld [vmem:[#allocation3] ss:$16 sps:$4 sm:$0xff]  }
  0x1d   :  { %v81_v32 = vrot.slane %v73_v27, %v63_v15  ;;  %v1622_v41 = vld [vmem:[#allocation3 + $0x8] ss:$16 sps:$4 sm:$0xff]   ;;  %446 = vmatprep.subr.bf16.mxu0 %v1616_v38  ;;  %v1628_v42 = vld [vmem:[#allocation3 + $0x24] ss:$16 sps:$4 sm:$0xff]   ;;  %v1630_v43 = vld [vmem:[#allocation3 + $0x2c] ss:$16 sps:$4 sm:$0xff]  }
  0x1e   :  { %v72_v34 = vcombine.low %v64_v29, %v71_v30  ;;  %v88_v35 = vrot.slane %v74_v31, %v63_v15  ;;  %199 = vmatpush1.bf16.msra.mxu1 %v150_v33  ;;  %v1632_v44 = vld [vmem:[#allocation3 + $0x20] ss:$16 sps:$4 sm:$0xff]   ;;  %v1634_v45 = vld [vmem:[#allocation3 + $0x28] ss:$16 sps:$4 sm:$0xff]   ;;  %v1640_v46 = vld [vmem:[#allocation3 + $0x44] ss:$16 sps:$4 sm:$0xff]  }
  0x1f   :  { %487 = vmatprep.subr.bf16.mxu1 %v1618_v39  ;;  %v1642_v47 = vld [vmem:[#allocation3 + $0x4c] ss:$16 sps:$4 sm:$0xff]   ;;  %v1644_v48 = vld [vmem:[#allocation3 + $0x40] ss:$16 sps:$4 sm:$0xff]   ;;  %v1646_v49 = vld [vmem:[#allocation3 + $0x48] ss:$16 sps:$4 sm:$0xff]  }
  0x20   :  { %v89_v36 = vcombine.low %v81_v32, %v88_v35  ;;  %v1652_v50 = vld [vmem:[#allocation3 + $0x64] ss:$16 sps:$4 sm:$0xff]   ;;  %v1654_v51 = vld [vmem:[#allocation3 + $0x6c] ss:$16 sps:$4 sm:$0xff]   ;;  %v1656_v52 = vld [vmem:[#allocation3 + $0x60] ss:$16 sps:$4 sm:$0xff]  }
  0x21   :  { %v1658_v53 = vld [vmem:[#allocation3 + $0x68] ss:$16 sps:$4 sm:$0xff]   ;;  %v1664_v54 = vld [vmem:[#allocation3 + $0x84] ss:$16 sps:$4 sm:$0xff]   ;;  %v1666_v55 = vld [vmem:[#allocation3 + $0x8c] ss:$16 sps:$4 sm:$0xff]  }
  0x22   :  { %v92_v37 = vpack.c.bf16 %v89_v36, %v72_v34  ;;  %v1668_v56 = vld [vmem:[#allocation3 + $0x80] ss:$16 sps:$4 sm:$0xff]   ;;  %v1670_v57 = vld [vmem:[#allocation3 + $0x88] ss:$16 sps:$4 sm:$0xff]   ;;  %v1672_v58 = vld [vmem:[#allocation3 + $0xa4] ss:$16 sps:$4 sm:$0xff]  }
  0x23   :  { %v1676_v59 = vld [vmem:[#allocation3 + $0xac] ss:$16 sps:$4 sm:$0xff]   ;;  %v1680_v60 = vld [vmem:[#allocation3 + $0xa0] ss:$16 sps:$4 sm:$0xff]   ;;  %v1682_v61 = vld [vmem:[#allocation3 + $0xa8] ss:$16 sps:$4 sm:$0xff]  }
  0x24   :  { %1319 = vmatmul.mubr.msk.bf16.vlgmr.msra.gmra.mrb[0].mxu0 %vm135_vm2, %v92_v37  ;;  %1320 = vmatmul.mubr.msk.bf16.vlgmr.msra.gmra.mrb[0].mxu1 %vm135_vm2, %v92_v37  ;;  %v1686_v62 = vld [vmem:[#allocation3 + $0xc4] ss:$16 sps:$4 sm:$0xff]   ;;  %v1688_v63 = vld [vmem:[#allocation3 + $0xcc] ss:$16 sps:$4 sm:$0xff]   ;;  %v1692_v0 = vld [vmem:[#allocation3 + $0xc0] ss:$16 sps:$4 sm:$0xff]  }
  0x25   :  { %478 = vmatprep.mubr.bf16.mxu0 %v1520_v1  ;;  %519 = vmatprep.mubr.bf16.mxu1 %v1520_v1  ;;  %v1694_v2 = vld [vmem:[#allocation3 + $0xc8] ss:$16 sps:$4 sm:$0xff]   ;;  %v1698_v3 = vld [vmem:[#allocation3 + $0xe4] ss:$16 sps:$4 sm:$0xff]   ;;  %v1700_v4 = vld [vmem:[#allocation3 + $0xec] ss:$16 sps:$4 sm:$0xff]  }
  0x26   :  { %447 = vmatpush1.bf16.msra.mxu0 %v1620_v40  ;;  %488 = vmatpush1.bf16.msra.mxu1 %v1622_v41  ;;  %v1704_v5 = vld [vmem:[#allocation3 + $0xe0] ss:$16 sps:$4 sm:$0xff]   ;;  %v1706_v6 = vld [vmem:[#allocation3 + $0xe8] ss:$16 sps:$4 sm:$0xff]   ;;  %v109_v10 = vsub.s32 2, %v1575_v8  ;;  %v113_v11 = vsub.s32 3, %v1575_v8 }
  0x27   :  { %448 = vmatprep.subr.bf16.mxu0 %v1628_v42  ;;  %489 = vmatprep.subr.bf16.mxu1 %v1630_v43  ;;  %v97_v9 = vld [vmem:[%s2010_s3] sm:$0xf]  ;;  %v105_v13 = vsub.s32 1, %v1575_v8  ;;  %vm1308_vm4 = vcmask 7174  }
  0x28   :  { %v102_v12 = vrot.slane %v97_v9, %v101_v7  ;;  %v110_v14 = vrot.slane %v97_v9, %v109_v10  ;;  %v114_v17 = vrot.slane %v97_v9, %v113_v11 }
  0x29   :  { %v1725_v21 = vrot.slane %v97_v9, %v105_v13 }
  0x2a   :  { %449 = vmatpush1.bf16.msra.mxu0 %v1632_v44  ;;  %490 = vmatpush1.bf16.msra.mxu1 %v1634_v45 }
  0x2b   :  { %450 = vmatprep.subr.bf16.mxu0 %v1640_v46  ;;  %491 = vmatprep.subr.bf16.mxu1 %v1642_v47 }
  0x2e   :  { %451 = vmatpush1.bf16.msra.mxu0 %v1644_v48  ;;  %492 = vmatpush1.bf16.msra.mxu1 %v1646_v49 }
  0x2f   :  { %452 = vmatprep.subr.bf16.mxu0 %v1652_v50  ;;  %493 = vmatprep.subr.bf16.mxu1 %v1654_v51 }
  0x32   :  { %453 = vmatpush1.bf16.msra.mxu0 %v1656_v52  ;;  %494 = vmatpush1.bf16.msra.mxu1 %v1658_v53 }
  0x33   :  { %454 = vmatprep.subr.bf16.mxu0 %v1664_v54  ;;  %495 = vmatprep.subr.bf16.mxu1 %v1666_v55 }
  0x36   :  { %455 = vmatpush1.bf16.msra.mxu0 %v1668_v56  ;;  %496 = vmatpush1.bf16.msra.mxu1 %v1670_v57 }
  0x37   :  { %456 = vmatprep.subr.bf16.mxu0 %v1672_v58  ;;  %497 = vmatprep.subr.bf16.mxu1 %v1676_v59 }
  0x3a   :  { %457 = vmatpush1.bf16.msra.mxu0 %v1680_v60  ;;  %498 = vmatpush1.bf16.msra.mxu1 %v1682_v61 }
  0x3b   :  { %458 = vmatprep.subr.bf16.mxu0 %v1686_v62  ;;  %499 = vmatprep.subr.bf16.mxu1 %v1688_v63 }
  0x3e   :  { %459 = vmatpush1.bf16.msra.mxu0 %v1692_v0  ;;  %500 = vmatpush1.bf16.msra.mxu1 %v1694_v2 }
  0x3f   :  { %460 = vmatprep.subr.bf16.mxu0 %v1698_v3  ;;  %501 = vmatprep.subr.bf16.mxu1 %v1700_v4 }
  0x42   :  { %461 = vmatpush1.bf16.msra.mxu0 %v1704_v5  ;;  %502 = vmatpush1.bf16.msra.mxu1 %v1706_v6 }
  0x43   :  { %569 = vmatprep.subr.bf16.mxu0 %v1616_v38  ;;  %610 = vmatprep.subr.bf16.mxu1 %v1618_v39 }
  0xf7   :  { %v189_v15 = vpop.f32.mrb[0].mxu0  ;;  %v232_v16 = vpop.f32.mrb[0].mxu1 }
  0xf8   :  { %v1721_v18 = vadd.f32 %v189_v15, %v102_v12  ;;  %v1723_v19 = vpop.f32.mrb[1].mxu0  ;;  %v234_v20 = vpop.f32.mrb[1].mxu1  ;;  %v1730_v27 = vadd.f32 %v232_v16, %v110_v14 }
  0xf9   :  { %v193_v22 = vpop.f32.mrb[2].mxu0  ;;  %v236_v23 = vpop.f32.mrb[2].mxu1  ;;  %v1739_v31 = vadd.f32 %v234_v20, %v114_v17 }
  0xfa   :  { %v241_v24 = vmul.f32 0.5, %v1721_v18  ;;  %v1728_v25 = vadd.f32 %v193_v22, %v102_v12  ;;  %v195_v26 = vpop.f32.mrb[3].mxu0  ;;  %v1732_v8 = vadd.f32 %v236_v23, %v110_v14  ;;  %v238_v28 = vpop.f32.mrb[3].mxu1  ;;  %v1782_v22 = vadd.f32 %v1723_v19, %v1725_v21 }
  0xfb   :  { %v1735_v29 = vadd.f32 %v195_v26, %v1725_v21  ;;  %v1737_v30 = vadd.f32 %v238_v28, %v114_v17  ;;  %v247_v32 = vmul.f32 0.5, %v1739_v31 }
  0xfc   :  { %1415 = vtanh.f32 %v241_v24 }
  0xfd   :  { %1417 = vtanh.f32 %v1730_v27 }
  0xfe   :  { %1419 = vtanh.f32 %v247_v32 }
 0x106   :  { %v1416_v33 = vpop.eup %1415 }
 0x107   :  { %v243_v34 = vmul.f32 0.5, %v1416_v33  ;;  %v1418_v35 = vpop.eup %1417 }
 0x108   :  { %v1420_v7 = vpop.eup %1419 }
 0x109   :  { %v244_v36 = vadd.f32 0.5, %v243_v34  ;;  %v249_v9 = vmul.f32 0.5, %v1420_v7 }
 0x10b   :  { %v1743_v37 = vmul.f32 %v1418_v35, %v244_v36  ;;  %v250_v10 = vadd.f32 0.5, %v249_v9 }
 0x10d   :  { %1421 = vtanh.f32 %v1743_v37 }
 0x117   :  { %v1422_v11 = vpop.eup %1421 }
 0x118   :  { %v252_v12 = vmul.f32 %v1422_v11, %v250_v10 }
 0x11a   :  { %v253_v13 = vpack.c.bf16 %v252_v12, %v252_v12 }
 0x11c   :  { %479 = vmatmul.mubr.bf16.vlgmr.msra.gmra.mrb[4].mxu0 %v253_v13  ;;  %520 = vmatmul.mubr.bf16.vlgmr.msra.gmra.mrb[4].mxu1 %v253_v13 }
 0x11d   :  { %570 = vmatpush1.bf16.msra.mxu0 %v1620_v40  ;;  %611 = vmatpush1.bf16.msra.mxu1 %v1622_v41 }
 0x11e   :  { %571 = vmatprep.subr.bf16.mxu0 %v1628_v42  ;;  %612 = vmatprep.subr.bf16.mxu1 %v1630_v43 }
 0x11f   :  { %601 = vmatprep.mubr.bf16.mxu0 %v1520_v1  ;;  %642 = vmatprep.mubr.bf16.mxu1 %v1520_v1 }
 0x121   :  { %572 = vmatpush1.bf16.msra.mxu0 %v1632_v44  ;;  %613 = vmatpush1.bf16.msra.mxu1 %v1634_v45 }
 0x122   :  { %573 = vmatprep.subr.bf16.mxu0 %v1640_v46  ;;  %614 = vmatprep.subr.bf16.mxu1 %v1642_v47 }
 0x125   :  { %574 = vmatpush1.bf16.msra.mxu0 %v1644_v48  ;;  %615 = vmatpush1.bf16.msra.mxu1 %v1646_v49 }
 0x126   :  { %575 = vmatprep.subr.bf16.mxu0 %v1652_v50  ;;  %616 = vmatprep.subr.bf16.mxu1 %v1654_v51 }
 0x129   :  { %576 = vmatpush1.bf16.msra.mxu0 %v1656_v52  ;;  %617 = vmatpush1.bf16.msra.mxu1 %v1658_v53 }
 0x12a   :  { %577 = vmatprep.subr.bf16.mxu0 %v1664_v54  ;;  %618 = vmatprep.subr.bf16.mxu1 %v1666_v55 }
 0x12d   :  { %578 = vmatpush1.bf16.msra.mxu0 %v1668_v56  ;;  %619 = vmatpush1.bf16.msra.mxu1 %v1670_v57 }
 0x12e   :  { %579 = vmatprep.subr.bf16.mxu0 %v1672_v58  ;;  %620 = vmatprep.subr.bf16.mxu1 %v1676_v59 }
 0x131   :  { %580 = vmatpush1.bf16.msra.mxu0 %v1680_v60  ;;  %621 = vmatpush1.bf16.msra.mxu1 %v1682_v61 }
 0x132   :  { %581 = vmatprep.subr.bf16.mxu0 %v1686_v62  ;;  %622 = vmatprep.subr.bf16.mxu1 %v1688_v63 }
 0x135   :  { %582 = vmatpush1.bf16.msra.mxu0 %v1692_v0  ;;  %623 = vmatpush1.bf16.msra.mxu1 %v1694_v2 }
 0x136   :  { %583 = vmatprep.subr.bf16.mxu0 %v1698_v3  ;;  %624 = vmatprep.subr.bf16.mxu1 %v1700_v4 }
 0x139   :  { %584 = vmatpush1.bf16.msra.mxu0 %v1704_v5  ;;  %625 = vmatpush1.bf16.msra.mxu1 %v1706_v6 }
 0x13a   :  { %692 = vmatprep.subr.bf16.mxu0 %v1616_v38  ;;  %733 = vmatprep.subr.bf16.mxu1 %v1618_v39 }
 0x1ef   :  { %v480_v14 = vpop.f32.mrb[4].mxu0  ;;  %v521_v15 = vpop.f32.mrb[4].mxu1 }
 0x1f0   :  { %v532_v16 = vrot.slane %v480_v14, 6  ;;  %v482_v17 = vpop.f32.mrb[5].mxu0  ;;  %v523_v20 = vpop.f32.mrb[5].mxu1  ;;  %v534_v32 = vrot.slane %v521_v15, 6 }
 0x1f1   :  { %v533_v23 = vrot.slane %v482_v17, 6  ;;  %v484_v24 = vpop.f32.mrb[6].mxu0  ;;  %v525_v26 = vpop.f32.mrb[6].mxu1  ;;  %v535_v10 = vrot.slane %v523_v20, 6 }
 0x1f2   :  { %v540_v28 = vadd.f32 %v532_v16, %v1721_v18  ;;  %v485_v33 = vpop.f32.mrb[7].mxu0  ;;  %v526_v34 = vpop.f32.mrb[7].mxu1  ;;  %v542_v9 = vadd.f32 %v534_v32, %v1730_v27 }
 0x1f3   :  { %v541_v35 = vadd.f32 %v533_v23, %v1782_v22  ;;  %v543_v19 = vadd.f32 %v535_v10, %v1739_v31  ;;  %v549_v23 = vrot.slane %v1743_v37, 6 }
 0x1f4   :  { %v552_v36 = vmul.f32 0.5, %v540_v28 }
 0x1f5   :  { %v544_v7 = vmul.f32 0.5, %v541_v35  ;;  %v559_v21 = vmul.f32 0.5, %v543_v19 }
 0x1f6   :  { %1423 = vtanh.f32 %v552_v36 }
 0x1f7   :  { %1425 = vtanh.f32 %v544_v7 }
 0x1f8   :  { %1427 = vtanh.f32 %v542_v9 }
 0x1f9   :  { %1429 = vtanh.f32 %v559_v21 }
 0x200   :  { %v1424_v11 = vpop.eup %1423 }
 0x201   :  { %v1426_v12 = vpop.eup %1425  ;;  %v554_v13 = vmul.f32 0.5, %v1424_v11 }
 0x202   :  { %v546_v14 = vmul.f32 0.5, %v1426_v12  ;;  %v1428_v16 = vpop.eup %1427 }
 0x203   :  { %v555_v15 = vadd.f32 0.5, %v554_v13  ;;  %v1430_v20 = vpop.eup %1429 }
 0x204   :  { %v547_v17 = vadd.f32 0.5, %v546_v14  ;;  %v561_v32 = vmul.f32 0.5, %v1430_v20 }
 0x205   :  { %v557_v24 = vmul.f32 %v1428_v16, %v555_v15 }
 0x206   :  { %v551_v26 = vmul.f32 %v549_v23, %v547_v17  ;;  %v562_v33 = vadd.f32 0.5, %v561_v32 }
 0x208   :  { %v1789_v28 = vadd.f32 %v557_v24, %v551_v26 }
 0x20a   :  { %1431 = vtanh.f32 %v1789_v28 }
 0x214   :  { %v1432_v34 = vpop.eup %1431 }
 0x215   :  { %v564_v35 = vmul.f32 %v1432_v34, %v562_v33 }
 0x217   :  { %v565_v36 = vpack.c.bf16 %v564_v35, %v564_v35 }
 0x219   :  { %v567_v7 = vrot.slane %v565_v36, 1 }
 0x21b   :  { %602 = vmatmul.mubr.bf16.vlgmr.msra.gmra.mrb[8].mxu0 %v567_v7  ;;  %643 = vmatmul.mubr.bf16.vlgmr.msra.gmra.mrb[8].mxu1 %v567_v7 }
 0x21c   :  { %693 = vmatpush1.bf16.msra.mxu0 %v1620_v40  ;;  %734 = vmatpush1.bf16.msra.mxu1 %v1622_v41 }
 0x21d   :  { %694 = vmatprep.subr.bf16.mxu0 %v1628_v42  ;;  %735 = vmatprep.subr.bf16.mxu1 %v1630_v43 }
 0x21e   :  { %724 = vmatprep.mubr.bf16.mxu0 %v1520_v1  ;;  %765 = vmatprep.mubr.bf16.mxu1 %v1520_v1 }
 0x220   :  { %695 = vmatpush1.bf16.msra.mxu0 %v1632_v44  ;;  %736 = vmatpush1.bf16.msra.mxu1 %v1634_v45 }
 0x221   :  { %696 = vmatprep.subr.bf16.mxu0 %v1640_v46  ;;  %737 = vmatprep.subr.bf16.mxu1 %v1642_v47 }
 0x224   :  { %697 = vmatpush1.bf16.msra.mxu0 %v1644_v48  ;;  %738 = vmatpush1.bf16.msra.mxu1 %v1646_v49 }
 0x225   :  { %698 = vmatprep.subr.bf16.mxu0 %v1652_v50  ;;  %739 = vmatprep.subr.bf16.mxu1 %v1654_v51 }
 0x228   :  { %699 = vmatpush1.bf16.msra.mxu0 %v1656_v52  ;;  %740 = vmatpush1.bf16.msra.mxu1 %v1658_v53 }
 0x229   :  { %700 = vmatprep.subr.bf16.mxu0 %v1664_v54  ;;  %741 = vmatprep.subr.bf16.mxu1 %v1666_v55 }
 0x22c   :  { %701 = vmatpush1.bf16.msra.mxu0 %v1668_v56  ;;  %742 = vmatpush1.bf16.msra.mxu1 %v1670_v57 }
 0x22d   :  { %702 = vmatprep.subr.bf16.mxu0 %v1672_v58  ;;  %743 = vmatprep.subr.bf16.mxu1 %v1676_v59 }
 0x230   :  { %703 = vmatpush1.bf16.msra.mxu0 %v1680_v60  ;;  %744 = vmatpush1.bf16.msra.mxu1 %v1682_v61 }
 0x231   :  { %704 = vmatprep.subr.bf16.mxu0 %v1686_v62  ;;  %745 = vmatprep.subr.bf16.mxu1 %v1688_v63 }
 0x234   :  { %705 = vmatpush1.bf16.msra.mxu0 %v1692_v0  ;;  %746 = vmatpush1.bf16.msra.mxu1 %v1694_v2 }
 0x235   :  { %706 = vmatprep.subr.bf16.mxu0 %v1698_v3  ;;  %747 = vmatprep.subr.bf16.mxu1 %v1700_v4 }
 0x238   :  { %707 = vmatpush1.bf16.msra.mxu0 %v1704_v5  ;;  %748 = vmatpush1.bf16.msra.mxu1 %v1706_v6 }
 0x239   :  { %815 = vmatprep.subr.bf16.mxu0 %v1616_v38  ;;  %856 = vmatprep.subr.bf16.mxu1 %v1618_v39 }
 0x2ee   :  { %v603_v37 = vpop.f32.mrb[8].mxu0  ;;  %v644_v9 = vpop.f32.mrb[8].mxu1 }
 0x2ef   :  { %v655_v10 = vrot.slane %v603_v37, 4  ;;  %v605_v19 = vpop.f32.mrb[9].mxu0  ;;  %v646_v21 = vpop.f32.mrb[9].mxu1  ;;  %v657_v15 = vrot.slane %v644_v9, 4 }
 0x2f0   :  { %v656_v11 = vrot.slane %v605_v19, 4  ;;  %v607_v12 = vpop.f32.mrb[10].mxu0  ;;  %v648_v13 = vpop.f32.mrb[10].mxu1  ;;  %v658_v32 = vrot.slane %v646_v21, 4 }
 0x2f1   :  { %v663_v14 = vadd.f32 %v655_v10, %v1721_v18  ;;  %v608_v16 = vpop.f32.mrb[11].mxu0  ;;  %v649_v17 = vpop.f32.mrb[11].mxu1  ;;  %v665_v20 = vadd.f32 %v657_v15, %v1730_v27 }
 0x2f2   :  { %v664_v23 = vadd.f32 %v656_v11, %v1782_v22  ;;  %v666_v33 = vadd.f32 %v658_v32, %v1739_v31  ;;  %v672_v11 = vrot.slane %v1789_v28, 6 }
 0x2f3   :  { %v675_v24 = vmul.f32 0.5, %v663_v14 }
 0x2f4   :  { %v667_v26 = vmul.f32 0.5, %v664_v23  ;;  %v682_v34 = vmul.f32 0.5, %v666_v33 }
 0x2f5   :  { %1433 = vtanh.f32 %v675_v24 }
 0x2f6   :  { %1435 = vtanh.f32 %v667_v26 }
 0x2f7   :  { %1437 = vtanh.f32 %v665_v20 }
 0x2f8   :  { %1439 = vtanh.f32 %v682_v34 }
 0x2ff   :  { %v1434_v35 = vpop.eup %1433 }
 0x300   :  { %v1436_v36 = vpop.eup %1435  ;;  %v677_v7 = vmul.f32 0.5, %v1434_v35 }
 0x301   :  { %v669_v37 = vmul.f32 0.5, %v1436_v36  ;;  %v1438_v10 = vpop.eup %1437 }
 0x302   :  { %v678_v9 = vadd.f32 0.5, %v677_v7  ;;  %v1440_v21 = vpop.eup %1439 }
 0x303   :  { %v670_v19 = vadd.f32 0.5, %v669_v37  ;;  %v684_v15 = vmul.f32 0.5, %v1440_v21 }
 0x304   :  { %v680_v12 = vmul.f32 %v1438_v10, %v678_v9 }
 0x305   :  { %v674_v13 = vmul.f32 %v672_v11, %v670_v19  ;;  %v685_v16 = vadd.f32 0.5, %v684_v15 }
 0x307   :  { %v1831_v14 = vadd.f32 %v680_v12, %v674_v13 }
 0x309   :  { %1441 = vtanh.f32 %v1831_v14 }
 0x313   :  { %v1442_v17 = vpop.eup %1441 }
 0x314   :  { %v687_v23 = vmul.f32 %v1442_v17, %v685_v16 }
 0x316   :  { %v688_v24 = vpack.c.bf16 %v687_v23, %v687_v23 }
 0x318   :  { %v690_v26 = vrot.slane %v688_v24, 2 }
 0x31a   :  { %725 = vmatmul.mubr.bf16.vlgmr.msra.gmra.mrb[12].mxu0 %v690_v26  ;;  %766 = vmatmul.mubr.bf16.vlgmr.msra.gmra.mrb[12].mxu1 %v690_v26 }
 0x31b   :  { %816 = vmatpush1.bf16.msra.mxu0 %v1620_v40  ;;  %857 = vmatpush1.bf16.msra.mxu1 %v1622_v41 }
 0x31c   :  { %817 = vmatprep.subr.bf16.mxu0 %v1628_v42  ;;  %858 = vmatprep.subr.bf16.mxu1 %v1630_v43 }
 0x31d   :  { %847 = vmatprep.mubr.bf16.mxu0 %v1520_v1  ;;  %888 = vmatprep.mubr.bf16.mxu1 %v1520_v1 }
 0x31f   :  { %818 = vmatpush1.bf16.msra.mxu0 %v1632_v44  ;;  %859 = vmatpush1.bf16.msra.mxu1 %v1634_v45 }
 0x320   :  { %819 = vmatprep.subr.bf16.mxu0 %v1640_v46  ;;  %860 = vmatprep.subr.bf16.mxu1 %v1642_v47 }
 0x323   :  { %820 = vmatpush1.bf16.msra.mxu0 %v1644_v48  ;;  %861 = vmatpush1.bf16.msra.mxu1 %v1646_v49 }
 0x324   :  { %821 = vmatprep.subr.bf16.mxu0 %v1652_v50  ;;  %862 = vmatprep.subr.bf16.mxu1 %v1654_v51 }
 0x327   :  { %822 = vmatpush1.bf16.msra.mxu0 %v1656_v52  ;;  %863 = vmatpush1.bf16.msra.mxu1 %v1658_v53 }
 0x328   :  { %823 = vmatprep.subr.bf16.mxu0 %v1664_v54  ;;  %864 = vmatprep.subr.bf16.mxu1 %v1666_v55 }
 0x32b   :  { %824 = vmatpush1.bf16.msra.mxu0 %v1668_v56  ;;  %865 = vmatpush1.bf16.msra.mxu1 %v1670_v57 }
 0x32c   :  { %825 = vmatprep.subr.bf16.mxu0 %v1672_v58  ;;  %866 = vmatprep.subr.bf16.mxu1 %v1676_v59 }
 0x32f   :  { %826 = vmatpush1.bf16.msra.mxu0 %v1680_v60  ;;  %867 = vmatpush1.bf16.msra.mxu1 %v1682_v61 }
 0x330   :  { %827 = vmatprep.subr.bf16.mxu0 %v1686_v62  ;;  %868 = vmatprep.subr.bf16.mxu1 %v1688_v63 }
 0x333   :  { %828 = vmatpush1.bf16.msra.mxu0 %v1692_v0  ;;  %869 = vmatpush1.bf16.msra.mxu1 %v1694_v2 }
 0x334   :  { %829 = vmatprep.subr.bf16.mxu0 %v1698_v3  ;;  %870 = vmatprep.subr.bf16.mxu1 %v1700_v4 }
 0x337   :  { %830 = vmatpush1.bf16.msra.mxu0 %v1704_v5  ;;  %871 = vmatpush1.bf16.msra.mxu1 %v1706_v6 }
 0x338   :  { %923 = vmatprep.subr.bf16.mxu0 %v1616_v38  ;;  %964 = vmatprep.subr.bf16.mxu1 %v1618_v39 }
 0x3ed   :  { %v726_v28 = vpop.f32.mrb[12].mxu0  ;;  %v767_v20 = vpop.f32.mrb[12].mxu1 }
 0x3ee   :  { %v778_v32 = vrot.slane %v726_v28, 2  ;;  %v728_v33 = vpop.f32.mrb[13].mxu0  ;;  %v769_v34 = vpop.f32.mrb[13].mxu1  ;;  %v780_v9 = vrot.slane %v767_v20, 2 }
 0x3ef   :  { %v779_v35 = vrot.slane %v728_v33, 2  ;;  %v730_v36 = vpop.f32.mrb[14].mxu0  ;;  %v771_v7 = vpop.f32.mrb[14].mxu1  ;;  %v781_v15 = vrot.slane %v769_v34, 2 }
 0x3f0   :  { %v786_v37 = vadd.f32 %v778_v32, %v1721_v18  ;;  %v731_v10 = vpop.f32.mrb[15].mxu0  ;;  %v772_v19 = vpop.f32.mrb[15].mxu1  ;;  %v788_v21 = vadd.f32 %v780_v9, %v1730_v27 }
 0x3f1   :  { %v787_v11 = vadd.f32 %v779_v35, %v1782_v22  ;;  %v789_v16 = vadd.f32 %v781_v15, %v1739_v31  ;;  %v795_v22 = vrot.slane %v1831_v14, 6 }
 0x3f2   :  { %v798_v12 = vmul.f32 0.5, %v786_v37 }
 0x3f3   :  { %v790_v13 = vmul.f32 0.5, %v787_v11  ;;  %v805_v17 = vmul.f32 0.5, %v789_v16 }
 0x3f4   :  { %1443 = vtanh.f32 %v798_v12 }
 0x3f5   :  { %1445 = vtanh.f32 %v790_v13 }
 0x3f6   :  { %1447 = vtanh.f32 %v788_v21 }
 0x3f7   :  { %1449 = vtanh.f32 %v805_v17 }
 0x3fe   :  { %v1444_v23 = vpop.eup %1443 }
 0x3ff   :  { %v1446_v24 = vpop.eup %1445  ;;  %v800_v26 = vmul.f32 0.5, %v1444_v23 }
 0x400   :  { %v792_v18 = vmul.f32 0.5, %v1446_v24  ;;  %v1448_v20 = vpop.eup %1447 }
 0x401   :  { %v801_v28 = vadd.f32 0.5, %v800_v26  ;;  %v1450_v27 = vpop.eup %1449 }
 0x402   :  { %v793_v32 = vadd.f32 0.5, %v792_v18  ;;  %v807_v34 = vmul.f32 0.5, %v1450_v27 }
 0x403   :  { %v803_v33 = vmul.f32 %v1448_v20, %v801_v28 }
 0x404   :  { %v797_v35 = vmul.f32 %v795_v22, %v793_v32  ;;  %v808_v31 = vadd.f32 0.5, %v807_v34 }
 0x406   :  { %v1873_v36 = vadd.f32 %v803_v33, %v797_v35 }
 0x408   :  { %1451 = vtanh.f32 %v1873_v36 }
 0x412   :  { %v1452_v7 = vpop.eup %1451 }
 0x413   :  { %v810_v37 = vmul.f32 %v1452_v7, %v808_v31  ;;  %v906_v7 = vrot.slane %v1873_v36, 6 }
 0x415   :  { %v811_v9 = vpack.c.bf16 %v810_v37, %v810_v37 }
 0x417   :  { %v813_v10 = vrot.slane %v811_v9, 3 }
 0x419   :  { %848 = vmatmul.mubr.bf16.vlgmr.msra.gmra.mrb[16].mxu0 %v813_v10  ;;  %889 = vmatmul.mubr.bf16.vlgmr.msra.gmra.mrb[16].mxu1 %v813_v10 }
 0x41a   :  { %924 = vmatpush1.bf16.msra.mxu0 %v1620_v40  ;;  %965 = vmatpush1.bf16.msra.mxu1 %v1622_v41 }
 0x41b   :  { %925 = vmatprep.subr.bf16.mxu0 %v1628_v42  ;;  %966 = vmatprep.subr.bf16.mxu1 %v1630_v43 }
 0x41c   :  { %955 = vmatprep.mubr.bf16.mxu0 %v1520_v1  ;;  %996 = vmatprep.mubr.bf16.mxu1 %v1520_v1 }
 0x41e   :  { %926 = vmatpush1.bf16.msra.mxu0 %v1632_v44  ;;  %967 = vmatpush1.bf16.msra.mxu1 %v1634_v45 }
 0x41f   :  { %927 = vmatprep.subr.bf16.mxu0 %v1640_v46  ;;  %968 = vmatprep.subr.bf16.mxu1 %v1642_v47 }
 0x422   :  { %928 = vmatpush1.bf16.msra.mxu0 %v1644_v48  ;;  %969 = vmatpush1.bf16.msra.mxu1 %v1646_v49 }
 0x423   :  { %929 = vmatprep.subr.bf16.mxu0 %v1652_v50  ;;  %970 = vmatprep.subr.bf16.mxu1 %v1654_v51 }
 0x426   :  { %930 = vmatpush1.bf16.msra.mxu0 %v1656_v52  ;;  %971 = vmatpush1.bf16.msra.mxu1 %v1658_v53 }
 0x427   :  { %931 = vmatprep.subr.bf16.mxu0 %v1664_v54  ;;  %972 = vmatprep.subr.bf16.mxu1 %v1666_v55 }
 0x42a   :  { %932 = vmatpush1.bf16.msra.mxu0 %v1668_v56  ;;  %973 = vmatpush1.bf16.msra.mxu1 %v1670_v57 }
 0x42b   :  { %933 = vmatprep.subr.bf16.mxu0 %v1672_v58  ;;  %974 = vmatprep.subr.bf16.mxu1 %v1676_v59 }
 0x42e   :  { %934 = vmatpush1.bf16.msra.mxu0 %v1680_v60  ;;  %975 = vmatpush1.bf16.msra.mxu1 %v1682_v61 }
 0x42f   :  { %935 = vmatprep.subr.bf16.mxu0 %v1686_v62  ;;  %976 = vmatprep.subr.bf16.mxu1 %v1688_v63 }
 0x432   :  { %936 = vmatpush1.bf16.msra.mxu0 %v1692_v0  ;;  %977 = vmatpush1.bf16.msra.mxu1 %v1694_v2 }
 0x433   :  { %937 = vmatprep.subr.bf16.mxu0 %v1698_v3  ;;  %978 = vmatprep.subr.bf16.mxu1 %v1700_v4 }
 0x436   :  { %938 = vmatpush1.bf16.msra.mxu0 %v1704_v5  ;;  %979 = vmatpush1.bf16.msra.mxu1 %v1706_v6 }
 0x437   :  { %1046 = vmatprep.subr.bf16.mxu0 %v1616_v38  ;;  %1087 = vmatprep.subr.bf16.mxu1 %v1618_v39 }
 0x4ec   :  { %v849_v14 = vpop.f32.mrb[16].mxu0  ;;  %v890_v19 = vpop.f32.mrb[16].mxu1 }
 0x4ed   :  { %v897_v11 = vadd.f32 %v849_v14, %v1728_v25  ;;  %v851_v12 = vpop.f32.mrb[17].mxu0  ;;  %v892_v13 = vpop.f32.mrb[17].mxu1  ;;  %v899_v18 = vadd.f32 %v890_v19, %v1732_v8 }
 0x4ee   :  { %v898_v21 = vadd.f32 %v851_v12, %v1735_v29  ;;  %v853_v15 = vpop.f32.mrb[18].mxu0  ;;  %v894_v16 = vpop.f32.mrb[18].mxu1  ;;  %v900_v28 = vadd.f32 %v892_v13, %v1737_v30 }
 0x4ef   :  { %v909_v17 = vmul.f32 0.5, %v897_v11  ;;  %v854_v23 = vpop.f32.mrb[19].mxu0  ;;  %v895_v24 = vpop.f32.mrb[19].mxu1 }
 0x4f0   :  { %v901_v26 = vmul.f32 0.5, %v898_v21  ;;  %v916_v20 = vmul.f32 0.5, %v900_v28 }
 0x4f1   :  { %1453 = vtanh.f32 %v909_v17 }
 0x4f2   :  { %1455 = vtanh.f32 %v901_v26 }
 0x4f3   :  { %1457 = vtanh.f32 %v899_v18 }
 0x4f4   :  { %1459 = vtanh.f32 %v916_v20 }
 0x4fb   :  { %v1454_v32 = vpop.eup %1453 }
 0x4fc   :  { %v1456_v22 = vpop.eup %1455  ;;  %v911_v33 = vmul.f32 0.5, %v1454_v32 }
 0x4fd   :  { %v903_v35 = vmul.f32 0.5, %v1456_v22  ;;  %v1458_v34 = vpop.eup %1457 }
 0x4fe   :  { %v912_v27 = vadd.f32 0.5, %v911_v33  ;;  %v1460_v14 = vpop.eup %1459 }
 0x4ff   :  { %v904_v31 = vadd.f32 0.5, %v903_v35  ;;  %v918_v19 = vmul.f32 0.5, %v1460_v14 }
 0x500   :  { %v914_v37 = vmul.f32 %v1458_v34, %v912_v27 }
 0x501   :  { %v908_v9 = vmul.f32 %v906_v7, %v904_v31  ;;  %v919_v11 = vadd.f32 0.5, %v918_v19 }
 0x503   :  { %v1915_v10 = vadd.f32 %v914_v37, %v908_v9 }
 0x505   :  { %1461 = vtanh.f32 %v1915_v10 }
 0x50f   :  { %v1462_v12 = vpop.eup %1461 }
 0x510   :  { %v921_v13 = vmul.f32 %v1462_v12, %v919_v11 }
 0x512   :  { %v922_v21 = vpack.c.bf16 %v921_v13, %v921_v13  ;;  %v1026_v13 = vrot.slane %v1915_v10, 6 }
 0x514   :  { %956 = vmatmul.mubr.bf16.vlgmr.msra.gmra.mrb[20].mxu0 %v922_v21  ;;  %997 = vmatmul.mubr.bf16.vlgmr.msra.gmra.mrb[20].mxu1 %v922_v21 }
 0x515   :  { %1047 = vmatpush1.bf16.msra.mxu0 %v1620_v40  ;;  %1088 = vmatpush1.bf16.msra.mxu1 %v1622_v41 }
 0x516   :  { %1048 = vmatprep.subr.bf16.mxu0 %v1628_v42  ;;  %1089 = vmatprep.subr.bf16.mxu1 %v1630_v43 }
 0x517   :  { %1078 = vmatprep.mubr.bf16.mxu0 %v1520_v1  ;;  %1119 = vmatprep.mubr.bf16.mxu1 %v1520_v1 }
 0x519   :  { %1049 = vmatpush1.bf16.msra.mxu0 %v1632_v44  ;;  %1090 = vmatpush1.bf16.msra.mxu1 %v1634_v45 }
 0x51a   :  { %1050 = vmatprep.subr.bf16.mxu0 %v1640_v46  ;;  %1091 = vmatprep.subr.bf16.mxu1 %v1642_v47 }
 0x51d   :  { %1051 = vmatpush1.bf16.msra.mxu0 %v1644_v48  ;;  %1092 = vmatpush1.bf16.msra.mxu1 %v1646_v49 }
 0x51e   :  { %1052 = vmatprep.subr.bf16.mxu0 %v1652_v50  ;;  %1093 = vmatprep.subr.bf16.mxu1 %v1654_v51 }
 0x521   :  { %1053 = vmatpush1.bf16.msra.mxu0 %v1656_v52  ;;  %1094 = vmatpush1.bf16.msra.mxu1 %v1658_v53 }
 0x522   :  { %1054 = vmatprep.subr.bf16.mxu0 %v1664_v54  ;;  %1095 = vmatprep.subr.bf16.mxu1 %v1666_v55 }
 0x525   :  { %1055 = vmatpush1.bf16.msra.mxu0 %v1668_v56  ;;  %1096 = vmatpush1.bf16.msra.mxu1 %v1670_v57 }
 0x526   :  { %1056 = vmatprep.subr.bf16.mxu0 %v1672_v58  ;;  %1097 = vmatprep.subr.bf16.mxu1 %v1676_v59 }
 0x529   :  { %1057 = vmatpush1.bf16.msra.mxu0 %v1680_v60  ;;  %1098 = vmatpush1.bf16.msra.mxu1 %v1682_v61 }
 0x52a   :  { %1058 = vmatprep.subr.bf16.mxu0 %v1686_v62  ;;  %1099 = vmatprep.subr.bf16.mxu1 %v1688_v63 }
 0x52d   :  { %1059 = vmatpush1.bf16.msra.mxu0 %v1692_v0  ;;  %1100 = vmatpush1.bf16.msra.mxu1 %v1694_v2 }
 0x52e   :  { %1060 = vmatprep.subr.bf16.mxu0 %v1698_v3  ;;  %1101 = vmatprep.subr.bf16.mxu1 %v1700_v4 }
 0x531   :  { %1061 = vmatpush1.bf16.msra.mxu0 %v1704_v5  ;;  %1102 = vmatpush1.bf16.msra.mxu1 %v1706_v6 }
 0x532   :  { %1169 = vmatprep.subr.bf16.mxu0 %v1616_v38  ;;  %1210 = vmatprep.subr.bf16.mxu1 %v1618_v39 }
 0x5e7   :  { %v957_v36 = vpop.f32.mrb[20].mxu0  ;;  %v998_v15 = vpop.f32.mrb[20].mxu1 }
 0x5e8   :  { %v1009_v16 = vrot.slane %v957_v36, 6  ;;  %v959_v17 = vpop.f32.mrb[21].mxu0  ;;  %v1000_v23 = vpop.f32.mrb[21].mxu1  ;;  %v1011_v20 = vrot.slane %v998_v15, 6 }
 0x5e9   :  { %v1010_v24 = vrot.slane %v959_v17, 6  ;;  %v961_v26 = vpop.f32.mrb[22].mxu0  ;;  %v1002_v18 = vpop.f32.mrb[22].mxu1  ;;  %v1012_v39 = vrot.slane %v1000_v23, 6 }
 0x5ea   :  { %v1017_v28 = vadd.f32 %v1009_v16, %v1728_v25  ;;  %v962_v32 = vpop.f32.mrb[23].mxu0  ;;  %v1003_v22 = vpop.f32.mrb[23].mxu1  ;;  %v1019_v38 = vadd.f32 %v1011_v20, %v1732_v8 }
 0x5eb   :  { %v1018_v33 = vadd.f32 %v1010_v24, %v1735_v29  ;;  %v1020_v34 = vadd.f32 %v1012_v39, %v1737_v30 }
 0x5ec   :  { %v1029_v35 = vmul.f32 0.5, %v1017_v28 }
 0x5ed   :  { %v1021_v27 = vmul.f32 0.5, %v1018_v33  ;;  %v1036_v31 = vmul.f32 0.5, %v1020_v34 }
 0x5ee   :  { %1463 = vtanh.f32 %v1029_v35 }
 0x5ef   :  { %1465 = vtanh.f32 %v1021_v27 }
 0x5f0   :  { %1467 = vtanh.f32 %v1019_v38 }
 0x5f1   :  { %1469 = vtanh.f32 %v1036_v31 }
 0x5f8   :  { %v1464_v7 = vpop.eup %1463 }
 0x5f9   :  { %v1466_v37 = vpop.eup %1465  ;;  %v1031_v9 = vmul.f32 0.5, %v1464_v7 }
 0x5fa   :  { %v1023_v14 = vmul.f32 0.5, %v1466_v37  ;;  %v1468_v11 = vpop.eup %1467 }
 0x5fb   :  { %v1032_v19 = vadd.f32 0.5, %v1031_v9  ;;  %v1470_v16 = vpop.eup %1469 }
 0x5fc   :  { %v1024_v12 = vadd.f32 0.5, %v1023_v14  ;;  %v1038_v17 = vmul.f32 0.5, %v1470_v16 }
 0x5fd   :  { %v1034_v21 = vmul.f32 %v1468_v11, %v1032_v19 }
 0x5fe   :  { %v1028_v36 = vmul.f32 %v1026_v13, %v1024_v12  ;;  %v1039_v23 = vadd.f32 0.5, %v1038_v17 }
 0x600   :  { %v1957_v15 = vadd.f32 %v1034_v21, %v1028_v36 }
 0x602   :  { %1471 = vtanh.f32 %v1957_v15 }
 0x60c   :  { %v1472_v24 = vpop.eup %1471 }
 0x60d   :  { %v1041_v26 = vmul.f32 %v1472_v24, %v1039_v23 }
 0x60f   :  { %v1042_v18 = vpack.c.bf16 %v1041_v26, %v1041_v26 }
 0x611   :  { %v1044_v28 = vrot.slane %v1042_v18, 1 }
 0x613   :  { %1079 = vmatmul.mubr.bf16.vlgmr.msra.gmra.mrb[24].mxu0 %v1044_v28  ;;  %1120 = vmatmul.mubr.bf16.vlgmr.msra.gmra.mrb[24].mxu1 %v1044_v28 }
 0x614   :  { %1170 = vmatpush1.bf16.msra.mxu0 %v1620_v40  ;;  %1211 = vmatpush1.bf16.msra.mxu1 %v1622_v41 }
 0x615   :  { %1171 = vmatprep.subr.bf16.mxu0 %v1628_v42  ;;  %1212 = vmatprep.subr.bf16.mxu1 %v1630_v43 }
 0x616   :  { %1201 = vmatprep.mubr.bf16.mxu0 %v1520_v1  ;;  %1242 = vmatprep.mubr.bf16.mxu1 %v1520_v1 }
 0x618   :  { %1172 = vmatpush1.bf16.msra.mxu0 %v1632_v44  ;;  %1213 = vmatpush1.bf16.msra.mxu1 %v1634_v45 }
 0x619   :  { %1173 = vmatprep.subr.bf16.mxu0 %v1640_v46  ;;  %1214 = vmatprep.subr.bf16.mxu1 %v1642_v47 }
 0x61c   :  { %1174 = vmatpush1.bf16.msra.mxu0 %v1644_v48  ;;  %1215 = vmatpush1.bf16.msra.mxu1 %v1646_v49 }
 0x61d   :  { %1175 = vmatprep.subr.bf16.mxu0 %v1652_v50  ;;  %1216 = vmatprep.subr.bf16.mxu1 %v1654_v51 }
 0x620   :  { %1176 = vmatpush1.bf16.msra.mxu0 %v1656_v52  ;;  %1217 = vmatpush1.bf16.msra.mxu1 %v1658_v53 }
 0x621   :  { %1177 = vmatprep.subr.bf16.mxu0 %v1664_v54  ;;  %1218 = vmatprep.subr.bf16.mxu1 %v1666_v55 }
 0x624   :  { %1178 = vmatpush1.bf16.msra.mxu0 %v1668_v56  ;;  %1219 = vmatpush1.bf16.msra.mxu1 %v1670_v57 }
 0x625   :  { %1179 = vmatprep.subr.bf16.mxu0 %v1672_v58  ;;  %1220 = vmatprep.subr.bf16.mxu1 %v1676_v59 }
 0x628   :  { %1180 = vmatpush1.bf16.msra.mxu0 %v1680_v60  ;;  %1221 = vmatpush1.bf16.msra.mxu1 %v1682_v61 }
 0x629   :  { %1181 = vmatprep.subr.bf16.mxu0 %v1686_v62  ;;  %1222 = vmatprep.subr.bf16.mxu1 %v1688_v63 }
 0x62c   :  { %1182 = vmatpush1.bf16.msra.mxu0 %v1692_v0  ;;  %1223 = vmatpush1.bf16.msra.mxu1 %v1694_v2  ;;  %v1149_v2 = vrot.slane %v1957_v15, 6 }
 0x62d   :  { %1183 = vmatprep.subr.bf16.mxu0 %v1698_v3  ;;  %1224 = vmatprep.subr.bf16.mxu1 %v1700_v4 }
 0x630   :  { %1184 = vmatpush1.bf16.msra.mxu0 %v1704_v5  ;;  %1225 = vmatpush1.bf16.msra.mxu1 %v1706_v6 }
 0x6e6   :  { %v1080_v1 = vpop.f32.mrb[24].mxu0  ;;  %v1121_v40 = vpop.f32.mrb[24].mxu1 }
 0x6e7   :  { %v1132_v41 = vrot.slane %v1080_v1, 4  ;;  %v1082_v42 = vpop.f32.mrb[25].mxu0  ;;  %v1123_v43 = vpop.f32.mrb[25].mxu1  ;;  %v1134_v48 = vrot.slane %v1121_v40, 4 }
 0x6e8   :  { %v1133_v44 = vrot.slane %v1082_v42, 4  ;;  %v1084_v45 = vpop.f32.mrb[26].mxu0  ;;  %v1125_v46 = vpop.f32.mrb[26].mxu1  ;;  %v1135_v55 = vrot.slane %v1123_v43, 4 }
 0x6e9   :  { %v1140_v47 = vadd.f32 %v1132_v41, %v1728_v25  ;;  %v1085_v49 = vpop.f32.mrb[27].mxu0  ;;  %v1126_v50 = vpop.f32.mrb[27].mxu1  ;;  %v1142_v54 = vadd.f32 %v1134_v48, %v1732_v8 }
 0x6ea   :  { %v1141_v51 = vadd.f32 %v1133_v44, %v1735_v29  ;;  %v1143_v56 = vadd.f32 %v1135_v55, %v1737_v30  ;;  %v1354_v50 = vld [vmem:[#allocation2] ss:$0 sm:$0xff] }
 0x6eb   :  { %v1152_v52 = vmul.f32 0.5, %v1140_v47 }
 0x6ec   :  { %v1144_v53 = vmul.f32 0.5, %v1141_v51  ;;  %v1159_v57 = vmul.f32 0.5, %v1143_v56 }
 0x6ed   :  { %1473 = vtanh.f32 %v1152_v52 }
 0x6ee   :  { %1475 = vtanh.f32 %v1144_v53 }
 0x6ef   :  { %1477 = vtanh.f32 %v1142_v54 }
 0x6f0   :  { %1479 = vtanh.f32 %v1159_v57 }
 0x6f7   :  { %v1474_v58 = vpop.eup %1473 }
 0x6f8   :  { %v1476_v59 = vpop.eup %1475  ;;  %v1154_v60 = vmul.f32 0.5, %v1474_v58 }
 0x6f9   :  { %v1146_v61 = vmul.f32 0.5, %v1476_v59  ;;  %v1478_v63 = vpop.eup %1477 }
 0x6fa   :  { %v1155_v62 = vadd.f32 0.5, %v1154_v60  ;;  %v1480_v6 = vpop.eup %1479 }
 0x6fb   :  { %v1147_v0 = vadd.f32 0.5, %v1146_v61  ;;  %v1161_v10 = vmul.f32 0.5, %v1480_v6 }
 0x6fc   :  { %v1157_v3 = vmul.f32 %v1478_v63, %v1155_v62 }
 0x6fd   :  { %v1151_v4 = vmul.f32 %v1149_v2, %v1147_v0  ;;  %v1162_v20 = vadd.f32 0.5, %v1161_v10 }
 0x6ff   :  { %v1158_v5 = vadd.f32 %v1157_v3, %v1151_v4 }
 0x701   :  { %1481 = vtanh.f32 %v1158_v5 }
 0x70b   :  { %v1482_v32 = vpop.eup %1481 }
 0x70c   :  { %v1164_v22 = vmul.f32 %v1482_v32, %v1162_v20 }
 0x70e   :  { %v1165_v33 = vpack.c.bf16 %v1164_v22, %v1164_v22 }
 0x710   :  { %v1167_v35 = vrot.slane %v1165_v33, 2 }
 0x712   :  { %1202 = vmatmul.mubr.bf16.vlgmr.msra.gmra.mrb[28].mxu0 %v1167_v35  ;;  %1243 = vmatmul.mubr.bf16.vlgmr.msra.gmra.mrb[28].mxu1 %v1167_v35 }
 0x7e5   :  { %v1203_v27 = vpop.f32.mrb[28].mxu0  ;;  %v1244_v38 = vpop.f32.mrb[28].mxu1 }
 0x7e6   :  { %v1255_v39 = vrot.slane %v1203_v27, 2  ;;  %v1205_v34 = vpop.f32.mrb[29].mxu0  ;;  %v1246_v31 = vpop.f32.mrb[29].mxu1  ;;  %v1257_v19 = vrot.slane %v1244_v38, 2 }
 0x7e7   :  { %v1256_v7 = vrot.slane %v1205_v34, 2  ;;  %v1207_v37 = vpop.f32.mrb[30].mxu0  ;;  %v1248_v9 = vpop.f32.mrb[30].mxu1  ;;  %v1258_v16 = vrot.slane %v1246_v31, 2 }
 0x7e8   :  { %v1263_v14 = vadd.f32 %v1255_v39, %v1728_v25  ;;  %v1208_v11 = vpop.f32.mrb[31].mxu0  ;;  %v1249_v12 = vpop.f32.mrb[31].mxu1  ;;  %v1265_v15 = vadd.f32 %v1257_v19, %v1732_v8 }
 0x7e9   :  { %v1264_v13 = vadd.f32 %v1256_v7, %v1735_v29  ;;  %v1266_v17 = vadd.f32 %v1258_v16, %v1737_v30  ;;  %v1272_v29 = vrot.slane %v1158_v5, 6  ;;  %v1353_v30 = vld [vmem:[%s2011_s4] ss:$0 sm:$0xff] }
 0x7ea   :  { %v1275_v21 = vmul.f32 0.5, %v1263_v14 }
 0x7eb   :  { %v1267_v36 = vmul.f32 0.5, %v1264_v13  ;;  %v1282_v23 = vmul.f32 0.5, %v1266_v17 }
 0x7ec   :  { %1483 = vtanh.f32 %v1275_v21 }
 0x7ed   :  { %1485 = vtanh.f32 %v1267_v36 }
 0x7ee   :  { %1487 = vtanh.f32 %v1265_v15 }
 0x7ef   :  { %1489 = vtanh.f32 %v1282_v23 }
 0x7f6   :  { %v1484_v24 = vpop.eup %1483 }
 0x7f7   :  { %v1486_v26 = vpop.eup %1485  ;;  %v1277_v18 = vmul.f32 0.5, %v1484_v24 }
 0x7f8   :  { %v1269_v25 = vmul.f32 0.5, %v1486_v26  ;;  %v1488_v1 = vpop.eup %1487 }
 0x7f9   :  { %v1278_v28 = vadd.f32 0.5, %v1277_v18  ;;  %v1490_v8 = vpop.eup %1489 }
 0x7fa   :  { %v1270_v40 = vadd.f32 0.5, %v1269_v25  ;;  %v1284_v44 = vmul.f32 0.5, %v1490_v8 }
 0x7fb   :  { %v1280_v41 = vmul.f32 %v1488_v1, %v1278_v28 }
 0x7fc   :  { %v1274_v42 = vmul.f32 %v1272_v29, %v1270_v40  ;;  %v1285_v45 = vadd.f32 0.5, %v1284_v44 }
 0x7fe   :  { %v1281_v43 = vadd.f32 %v1280_v41, %v1274_v42 }
 0x800   :  { %1491 = vtanh.f32 %v1281_v43 }
 0x80a   :  { %v1492_v46 = vpop.eup %1491 }
 0x80b   :  { %v1287_v47 = vmul.f32 %v1492_v46, %v1285_v45 }
 0x80d   :  { %v1295_v48 = vmul.f32 %v1353_v30, %v1287_v47 }
 0x80f   :  { %v1297_v49 = vsel %vm1296_vm3, %v1295_v48, 0.0 }
 0x810   :  { %1298 = vadd.xlane.f32.xlu0 %v1297_v49 }
 0x89d   :  { %v1299_v51 = vpop.xlane.xlu0 %1298 }
 0x89e   :  { %v1307_v52 = vadd.f32 %v1354_v50, %v1299_v51 }
 0x8a0   :  { %1309 = vst.msk [vmem:[%s2013_s6 - $0x6] sm:$0xc0] %vm1308_vm4, %v1307_v52 }
 0x8a1   :  { %1314 = vsyncpa [#allocation4], 1 }

</bundles_post_ra>
